<compile_context>
chip_gen: v6e
topology: v6e:2x2x1
jax: 0.10.0
libtpu: 0.0.40
codegen_flags: <defaults>
</compile_context>

<pallas_src>
import functools

import jax
import jax.numpy as jnp
from jax.experimental import pallas as pl
from jax.experimental.pallas import tpu as pltpu


CFG = dict(
    vocab_size=30,
    max_pos=16,
    type_vocab=2,
    hidden=32,
    heads=2,
    intermediate=64,
    layers=2,
    polarities_dim=3,
)

_HEAD_PAD = 128  # lane-dense padding for the polarities head output


# ----------------------------------------------------------------------------
# In-kernel math helpers (traced inside the Pallas kernel)
# ----------------------------------------------------------------------------
def _erf(x):
    # Abramowitz & Stegun 7.1.26 surrogate (|err| <= 1.5e-7, i.e. f32-exact).
    # Uses only exp/mul/add/where so it lowers cleanly on TPU.
    z = jnp.abs(x)
    t = 1.0 / (1.0 + 0.3275911 * z)
    poly = ((((1.061405429 * t - 1.453152027) * t + 1.421413741) * t
             - 0.284496736) * t + 0.254829592) * t
    y = 1.0 - poly * jnp.exp(-z * z)
    return jnp.where(x < 0.0, -y, y)


def _gelu_exact(x):
    # Matches PyTorch / HF BERT exact (erf) GELU, not the tanh approximation.
    return 0.5 * x * (1.0 + _erf(x * 0.7071067811865476))


def _layernorm(x, g, b, eps):
    mean = jnp.mean(x, axis=-1, keepdims=True)
    var = jnp.mean(jnp.square(x - mean), axis=-1, keepdims=True)
    return (x - mean) * jax.lax.rsqrt(var + eps) * g + b


# ----------------------------------------------------------------------------
# Fused encoder + head kernel (one grid step per batch element)
# ----------------------------------------------------------------------------
def _fused_bert_kernel(
    x_ref,                               # [1, S, H]  embedded input
    emb_g_ref, emb_b_ref,                # [1, H]
    wqkv_ref, bqkv_ref,                  # [L, 3, H, H], [L, 3, 1, H]
    wo_ref, bo_ref,                      # [L, H, H],    [L, 1, H]
    ln1_g_ref, ln1_b_ref,                # [L, 1, H]
    w1_ref, b1_ref,                      # [L, H, I],    [L, 1, I]
    w2_ref, b2_ref,                      # [L, I, H],    [L, 1, H]
    ln2_g_ref, ln2_b_ref,                # [L, 1, H]
    head_w_ref, head_b_ref,              # [H, NP],      [1, NP]  (zero-padded)
    hid_ref,                             # [1, S, H]   last_hidden_state
    logits_ref,                          # [1, S, NP]  per-position logits
    *, layers, heads, eps):
    _, S, H = x_ref.shape
    Dh = H // heads
    scale = 1.0 / float(Dh) ** 0.5

    x = x_ref[0]                                                   # [S, H] f32
    x = _layernorm(x, emb_g_ref[...], emb_b_ref[...], eps)

    # Per-head lane masks, built once (no sub-128-lane slicing / concat in the
    # kernel body).  2-D iota as required on TPU.
    lane = jax.lax.broadcasted_iota(jnp.int32, (1, H), 1)
    head_masks = [
        ((lane >= h * Dh) & (lane < (h + 1) * Dh)).astype(jnp.float32)
        for h in range(heads)
    ]

    # Static unroll: tiny layer count, every weight slice is a static index
    # into a VMEM-resident ref.
    for l in range(layers):
        q = jnp.dot(x, wqkv_ref[l, 0],
                    preferred_element_type=jnp.float32) + bqkv_ref[l, 0]
        k = jnp.dot(x, wqkv_ref[l, 1],
                    preferred_element_type=jnp.float32) + bqkv_ref[l, 1]
        v = jnp.dot(x, wqkv_ref[l, 2],
                    preferred_element_type=jnp.float32) + bqkv_ref[l, 2]

        ctx = jnp.zeros((S, H), jnp.float32)
        for h in range(heads):
            m = head_masks[h]
            # Masked-lane contraction == per-head Q_h @ K_h^T (zero lanes drop
            # out of the K=H contraction; no lane slicing needed).
            s = jax.lax.dot_general(
                q * m, k, (((1,), (1,)), ((), ())),
                preferred_element_type=jnp.float32) * scale        # [S, S]
            s = s - jnp.max(s, axis=-1, keepdims=True)
            p = jnp.exp(s)
            p = p * pl.reciprocal(jnp.sum(p, axis=-1, keepdims=True),
                                  approx=True)
            # v*mask_h is zero outside head-h lanes -> summing merges heads.
            ctx = ctx + jnp.dot(p, v * m, preferred_element_type=jnp.float32)

        # Output projection + residual + LayerNorm (fused epilogue).
        attn_out = jnp.dot(ctx, wo_ref[l],
                           preferred_element_type=jnp.float32) + bo_ref[l]
        x = _layernorm(x + attn_out, ln1_g_ref[l], ln1_b_ref[l], eps)

        # FFN (exact-erf GELU) + residual + LayerNorm.
        ff = _gelu_exact(jnp.dot(x, w1_ref[l],
                                 preferred_element_type=jnp.float32) + b1_ref[l])
        ff = jnp.dot(ff, w2_ref[l],
                     preferred_element_type=jnp.float32) + b2_ref[l]
        x = _layernorm(x + ff, ln2_g_ref[l], ln2_b_ref[l], eps)

    hid_ref[0] = x.astype(hid_ref.dtype)

    # Classification head for every position, written lane-dense (NP=128
    # zero-padded).  The wrapper gathers mask positions and slices [:, :3];
    # dense() is per-position linear so this equals dense(mask_embeddings).
    logits = jnp.dot(x, head_w_ref[...],
                     preferred_element_type=jnp.float32) + head_b_ref[...]
    logits_ref[0] = logits.astype(logits_ref.dtype)


# ----------------------------------------------------------------------------
# Parameters (deterministic, layer weights stacked for the fused kernel)
# ----------------------------------------------------------------------------
def init_params(cfg):
    def norm(key, shape, scale=0.02):
        return (scale * jax.random.normal(key, shape)).astype(jnp.float32)

    keys = iter(jax.random.split(jax.random.PRNGKey(42), 64))
    H, I, L = cfg["hidden"], cfg["intermediate"], cfg["layers"]
    P, NP = cfg["polarities_dim"], _HEAD_PAD

    p = {
        "word_emb": norm(next(keys), (cfg["vocab_size"], H)),
        "pos_emb": norm(next(keys), (cfg["max_pos"], H)),
        "type_emb": norm(next(keys), (cfg["type_vocab"], H)),
        "emb_ln_g": jnp.ones((1, H), jnp.float32),
        "emb_ln_b": jnp.zeros((1, H), jnp.float32),
    }

    wqkv, wo, w1, w2 = [], [], [], []
    for _ in range(L):
        wqkv.append(jnp.stack([norm(next(keys), (H, H)) for _ in range(3)]))
        wo.append(norm(next(keys), (H, H)))
        w1.append(norm(next(keys), (H, I)))
        w2.append(norm(next(keys), (I, H)))

    p.update(
        wqkv=jnp.stack(wqkv),                                   # [L, 3, H, H]
        bqkv=jnp.zeros((L, 3, 1, H), jnp.float32),
        wo=jnp.stack(wo), bo=jnp.zeros((L, 1, H), jnp.float32),
        ln1_g=jnp.ones((L, 1, H), jnp.float32),
        ln1_b=jnp.zeros((L, 1, H), jnp.float32),
        w1=jnp.stack(w1), b1=jnp.zeros((L, 1, I), jnp.float32),
        w2=jnp.stack(w2), b2=jnp.zeros((L, 1, H), jnp.float32),
        ln2_g=jnp.ones((L, 1, H), jnp.float32),
        ln2_b=jnp.zeros((L, 1, H), jnp.float32),
    )

    # Classification head nn.Linear(bert_dim, polarities_dim), zero-padded to a
    # 128-lane-dense slab (wrapper slices [:, :P]).
    head_w = norm(next(keys), (H, P))
    p["head_w_pad"] = jnp.zeros((H, NP), jnp.float32).at[:, :P].set(head_w)
    p["head_b_pad"] = jnp.zeros((1, NP), jnp.float32)

    # NOTE: the BERT pooler (dense+tanh on [CLS]) is intentionally omitted —
    # BERT_Mask.forward discards pooler_output, so it is dead work.
    return p


# ----------------------------------------------------------------------------
# Forward pass (mirrors BERT_Mask.forward, eval mode)
# ----------------------------------------------------------------------------
def bert_mask_forward(params, bert_indices, mask_index, cfg=CFG):
    B, S = bert_indices.shape
    H, I, L = cfg["hidden"], cfg["intermediate"], cfg["layers"]
    NP = _HEAD_PAD

    # Embedding lookup (gather) is plain-JAX glue; token_type is segment 0 and
    # positions are 0..S-1, matching the default HF BERT call with indices only.
    x_emb = (params["word_emb"][bert_indices]
             + params["pos_emb"][jnp.arange(S)][None, :, :]
             + params["type_emb"][0][None, None, :]).astype(jnp.float32)

    kernel = functools.partial(
        _fused_bert_kernel, layers=L, heads=cfg["heads"], eps=1e-12)

    def full(shape):
        nd = len(shape)

        def index_map(b):
            return (0,) * nd

        return pl.BlockSpec(shape, index_map)

    in_specs = [
        pl.BlockSpec((1, S, H), lambda b: (b, 0, 0)),    # x_emb (per batch elt)
        full((1, H)), full((1, H)),                      # emb layernorm
        full((L, 3, H, H)), full((L, 3, 1, H)),          # stacked qkv
        full((L, H, H)), full((L, 1, H)),                # attn out proj
        full((L, 1, H)), full((L, 1, H)),                # ln1
        full((L, H, I)), full((L, 1, I)),                # ffn w1
        full((L, I, H)), full((L, 1, H)),                # ffn w2
        full((L, 1, H)), full((L, 1, H)),                # ln2
        full((H, NP)), full((1, NP)),                    # classification head
    ]
    out_specs = (
        pl.BlockSpec((1, S, H), lambda b: (b, 0, 0)),
        pl.BlockSpec((1, S, NP), lambda b: (b, 0, 0)),
    )
    out_shape = (
        jax.ShapeDtypeStruct((B, S, H), jnp.float32),
        jax.ShapeDtypeStruct((B, S, NP), jnp.float32),
    )

    last_hidden, logits_all = pl.pallas_call(
        kernel,
        grid=(B,),
        in_specs=in_specs,
        out_specs=out_specs,
        out_shape=out_shape,
        compiler_params=pltpu.CompilerParams(
            dimension_semantics=("parallel",)),   # v7x: one TC per batch elt
    )(x_emb,
      params["emb_ln_g"], params["emb_ln_b"],
      params["wqkv"], params["bqkv"],
      params["wo"], params["bo"],
      params["ln1_g"], params["ln1_b"],
      params["w1"], params["b1"],
      params["w2"], params["b2"],
      params["ln2_g"], params["ln2_b"],
      params["head_w_pad"], params["head_b_pad"])

    # Same semantics as the module: last_hidden_state[0, mask_index, :].
    # TODO(synk): nn.Dropout is declared but never applied in forward; omitted.
    mask_embeddings = last_hidden[0][mask_index, :]
    logits = logits_all[0][mask_index, :cfg["polarities_dim"]]
    return logits, mask_embeddings


if __name__ == "__main__":
    key = jax.random.PRNGKey(0)
    k_idx, _ = jax.random.split(key)

    batch, seq = 2, 8
    bert_indices = jax.random.randint(
        k_idx, (batch, seq), 0, CFG["vocab_size"], dtype=jnp.int32)
    mask_index = jnp.array([3, 5], dtype=jnp.int32)

    # Reproduce the module's `print(mask_index)` side effect.
    print(mask_index)

    params = init_params(CFG)

    @jax.jit
    def fwd(p, indices, m_idx):
        return bert_mask_forward(p, indices, m_idx, CFG)

    logits, mask_embeddings = fwd(params, bert_indices, mask_index)
    jax.block_until_ready((logits, mask_embeddings))

    assert logits.shape == (mask_index.shape[0], CFG["polarities_dim"])
    assert mask_embeddings.shape == (mask_index.shape[0], CFG["hidden"])
    assert bool(jnp.all(jnp.isfinite(logits)))
    assert bool(jnp.all(jnp.isfinite(mask_embeddings)))
    print("KERNEL_OK")
</pallas_src>

<mosaic_0001>
module attributes {stable_mosaic.version = 11 : i64} {
  func.func @_fused_bert_kernel(%arg0: i32, %arg1: memref<1x8x32xf32, #tpu.memory_space<vmem>>, %arg2: memref<1x32xf32, #tpu.memory_space<vmem>>, %arg3: memref<1x32xf32, #tpu.memory_space<vmem>>, %arg4: memref<2x3x32x32xf32, #tpu.memory_space<vmem>>, %arg5: memref<2x3x1x32xf32, #tpu.memory_space<vmem>>, %arg6: memref<2x32x32xf32, #tpu.memory_space<vmem>>, %arg7: memref<2x1x32xf32, #tpu.memory_space<vmem>>, %arg8: memref<2x1x32xf32, #tpu.memory_space<vmem>>, %arg9: memref<2x1x32xf32, #tpu.memory_space<vmem>>, %arg10: memref<2x32x64xf32, #tpu.memory_space<vmem>>, %arg11: memref<2x1x64xf32, #tpu.memory_space<vmem>>, %arg12: memref<2x64x32xf32, #tpu.memory_space<vmem>>, %arg13: memref<2x1x32xf32, #tpu.memory_space<vmem>>, %arg14: memref<2x1x32xf32, #tpu.memory_space<vmem>>, %arg15: memref<2x1x32xf32, #tpu.memory_space<vmem>>, %arg16: memref<32x128xf32, #tpu.memory_space<vmem>>, %arg17: memref<1x128xf32, #tpu.memory_space<vmem>>, %arg18: memref<1x8x32xf32, #tpu.memory_space<vmem>>, %arg19: memref<1x8x128xf32, #tpu.memory_space<vmem>>) attributes {dimension_semantics = [#tpu.dimension_semantics<parallel>], iteration_bounds = array<i64: 2>, scalar_prefetch = 0 : i64, scratch_operands = 0 : i64, tpu.core_type = #tpu.core_type<tc>, window_params = [{transform_indices = @transform_0, window_bounds = array<i64: 1, 8, 32>}, {pipeline_mode = #tpu.pipeline_mode<synchronous>, transform_indices = @transform_1, window_bounds = array<i64: 1, 32>}, {pipeline_mode = #tpu.pipeline_mode<synchronous>, transform_indices = @transform_2, window_bounds = array<i64: 1, 32>}, {pipeline_mode = #tpu.pipeline_mode<synchronous>, transform_indices = @transform_3, window_bounds = array<i64: 2, 3, 32, 32>}, {pipeline_mode = #tpu.pipeline_mode<synchronous>, transform_indices = @transform_4, window_bounds = array<i64: 2, 3, 1, 32>}, {pipeline_mode = #tpu.pipeline_mode<synchronous>, transform_indices = @transform_5, window_bounds = array<i64: 2, 32, 32>}, {pipeline_mode = #tpu.pipeline_mode<synchronous>, transform_indices = @transform_6, window_bounds = array<i64: 2, 1, 32>}, {pipeline_mode = #tpu.pipeline_mode<synchronous>, transform_indices = @transform_7, window_bounds = array<i64: 2, 1, 32>}, {pipeline_mode = #tpu.pipeline_mode<synchronous>, transform_indices = @transform_8, window_bounds = array<i64: 2, 1, 32>}, {pipeline_mode = #tpu.pipeline_mode<synchronous>, transform_indices = @transform_9, window_bounds = array<i64: 2, 32, 64>}, {pipeline_mode = #tpu.pipeline_mode<synchronous>, transform_indices = @transform_10, window_bounds = array<i64: 2, 1, 64>}, {pipeline_mode = #tpu.pipeline_mode<synchronous>, transform_indices = @transform_11, window_bounds = array<i64: 2, 64, 32>}, {pipeline_mode = #tpu.pipeline_mode<synchronous>, transform_indices = @transform_12, window_bounds = array<i64: 2, 1, 32>}, {pipeline_mode = #tpu.pipeline_mode<synchronous>, transform_indices = @transform_13, window_bounds = array<i64: 2, 1, 32>}, {pipeline_mode = #tpu.pipeline_mode<synchronous>, transform_indices = @transform_14, window_bounds = array<i64: 2, 1, 32>}, {pipeline_mode = #tpu.pipeline_mode<synchronous>, transform_indices = @transform_15, window_bounds = array<i64: 32, 128>}, {pipeline_mode = #tpu.pipeline_mode<synchronous>, transform_indices = @transform_16, window_bounds = array<i64: 1, 128>}, {transform_indices = @transform_17, window_bounds = array<i64: 1, 8, 32>}, {transform_indices = @transform_18, window_bounds = array<i64: 1, 8, 128>}]} {
    %c0 = arith.constant 0 : index
    %c0_0 = arith.constant 0 : index
    %c0_1 = arith.constant 0 : index
    %0 = vector.load %arg1[%c0, %c0_0, %c0_1] : memref<1x8x32xf32, #tpu.memory_space<vmem>>, vector<1x8x32xf32>
    %1 = vector.shape_cast %0 : vector<1x8x32xf32> to vector<8x32xf32>
    %c0_2 = arith.constant 0 : index
    %c0_3 = arith.constant 0 : index
    %2 = vector.load %arg2[%c0_2, %c0_3] : memref<1x32xf32, #tpu.memory_space<vmem>>, vector<1x32xf32>
    %c0_4 = arith.constant 0 : index
    %c0_5 = arith.constant 0 : index
    %3 = vector.load %arg3[%c0_4, %c0_5] : memref<1x32xf32, #tpu.memory_space<vmem>>, vector<1x32xf32>
    %cst = arith.constant dense<0.000000e+00> : vector<8xf32>
    %4 = vector.multi_reduction <add>, %1, %cst [1] : vector<8x32xf32> to vector<8xf32>
    %5 = vector.shape_cast %4 : vector<8xf32> to vector<8x1xf32>
    %cst_6 = arith.constant 3.200000e+01 : f32
    %6 = vector.broadcast %cst_6 : f32 to vector<8x1xf32>
    %7 = arith.divf %5, %6 : vector<8x1xf32>
    %8 = vector.broadcast %7 : vector<8x1xf32> to vector<8x32xf32>
    %9 = arith.subf %1, %8 : vector<8x32xf32>
    %10 = arith.mulf %9, %9 : vector<8x32xf32>
    %cst_7 = arith.constant dense<0.000000e+00> : vector<8xf32>
    %11 = vector.multi_reduction <add>, %10, %cst_7 [1] : vector<8x32xf32> to vector<8xf32>
    %12 = vector.shape_cast %11 : vector<8xf32> to vector<8x1xf32>
    %cst_8 = arith.constant 3.200000e+01 : f32
    %13 = vector.broadcast %cst_8 : f32 to vector<8x1xf32>
    %14 = arith.divf %12, %13 : vector<8x1xf32>
    %15 = vector.broadcast %7 : vector<8x1xf32> to vector<8x32xf32>
    %16 = arith.subf %1, %15 : vector<8x32xf32>
    %cst_9 = arith.constant 9.99999996E-13 : f32
    %17 = vector.broadcast %cst_9 : f32 to vector<8x1xf32>
    %18 = arith.addf %14, %17 : vector<8x1xf32>
    %19 = math.rsqrt %18 : vector<8x1xf32>
    %20 = vector.broadcast %19 : vector<8x1xf32> to vector<8x32xf32>
    %21 = arith.mulf %16, %20 : vector<8x32xf32>
    %22 = vector.broadcast %2 : vector<1x32xf32> to vector<8x32xf32>
    %23 = arith.mulf %21, %22 : vector<8x32xf32>
    %24 = vector.broadcast %3 : vector<1x32xf32> to vector<8x32xf32>
    %25 = arith.addf %23, %24 : vector<8x32xf32>
    %26 = tpu.iota {dimensions = array<i32: 1>} : vector<1x32xi32>
    %c0_i32 = arith.constant 0 : i32
    %27 = vector.broadcast %c0_i32 : i32 to vector<1x32xi32>
    %28 = arith.cmpi sge, %26, %27 : vector<1x32xi32>
    %c16_i32 = arith.constant 16 : i32
    %29 = vector.broadcast %c16_i32 : i32 to vector<1x32xi32>
    %30 = arith.cmpi slt, %26, %29 : vector<1x32xi32>
    %31 = arith.andi %28, %30 : vector<1x32xi1>
    %32 = arith.extui %31 : vector<1x32xi1> to vector<1x32xi32>
    %33 = arith.sitofp %32 : vector<1x32xi32> to vector<1x32xf32>
    %c16_i32_10 = arith.constant 16 : i32
    %34 = vector.broadcast %c16_i32_10 : i32 to vector<1x32xi32>
    %35 = arith.cmpi sge, %26, %34 : vector<1x32xi32>
    %c32_i32 = arith.constant 32 : i32
    %36 = vector.broadcast %c32_i32 : i32 to vector<1x32xi32>
    %37 = arith.cmpi slt, %26, %36 : vector<1x32xi32>
    %38 = arith.andi %35, %37 : vector<1x32xi1>
    %39 = arith.extui %38 : vector<1x32xi1> to vector<1x32xi32>
    %40 = arith.sitofp %39 : vector<1x32xi32> to vector<1x32xf32>
    %c0_11 = arith.constant 0 : index
    %c0_12 = arith.constant 0 : index
    %c0_13 = arith.constant 0 : index
    %c0_14 = arith.constant 0 : index
    %41 = vector.load %arg4[%c0_11, %c0_12, %c0_13, %c0_14] : memref<2x3x32x32xf32, #tpu.memory_space<vmem>>, vector<1x1x32x32xf32>
    %42 = vector.shape_cast %41 : vector<1x1x32x32xf32> to vector<32x32xf32>
    %cst_15 = arith.constant dense<0.000000e+00> : vector<8x32xf32>
    %43 = tpu.matmul %25, %42, %cst_15 {dimension_numbers = #tpu.dot_dimension_numbers<[1], [0], [0], [1], [0, 0, 1, 1], [], []>} : vector<8x32xf32>, vector<32x32xf32>, vector<8x32xf32> -> vector<8x32xf32>
    %c0_16 = arith.constant 0 : index
    %c0_17 = arith.constant 0 : index
    %c0_18 = arith.constant 0 : index
    %c0_19 = arith.constant 0 : index
    %44 = vector.load %arg5[%c0_16, %c0_17, %c0_18, %c0_19] : memref<2x3x1x32xf32, #tpu.memory_space<vmem>>, vector<1x1x1x32xf32>
    %45 = vector.shape_cast %44 : vector<1x1x1x32xf32> to vector<1x32xf32>
    %46 = vector.broadcast %45 : vector<1x32xf32> to vector<8x32xf32>
    %47 = arith.addf %43, %46 : vector<8x32xf32>
    %c0_20 = arith.constant 0 : index
    %c1 = arith.constant 1 : index
    %c0_21 = arith.constant 0 : index
    %c0_22 = arith.constant 0 : index
    %48 = vector.load %arg4[%c0_20, %c1, %c0_21, %c0_22] : memref<2x3x32x32xf32, #tpu.memory_space<vmem>>, vector<1x1x32x32xf32>
    %49 = vector.shape_cast %48 : vector<1x1x32x32xf32> to vector<32x32xf32>
    %cst_23 = arith.constant dense<0.000000e+00> : vector<8x32xf32>
    %50 = tpu.matmul %25, %49, %cst_23 {dimension_numbers = #tpu.dot_dimension_numbers<[1], [0], [0], [1], [0, 0, 1, 1], [], []>} : vector<8x32xf32>, vector<32x32xf32>, vector<8x32xf32> -> vector<8x32xf32>
    %c0_24 = arith.constant 0 : index
    %c1_25 = arith.constant 1 : index
    %c0_26 = arith.constant 0 : index
    %c0_27 = arith.constant 0 : index
    %51 = vector.load %arg5[%c0_24, %c1_25, %c0_26, %c0_27] : memref<2x3x1x32xf32, #tpu.memory_space<vmem>>, vector<1x1x1x32xf32>
    %52 = vector.shape_cast %51 : vector<1x1x1x32xf32> to vector<1x32xf32>
    %53 = vector.broadcast %52 : vector<1x32xf32> to vector<8x32xf32>
    %54 = arith.addf %50, %53 : vector<8x32xf32>
    %c0_28 = arith.constant 0 : index
    %c2 = arith.constant 2 : index
    %c0_29 = arith.constant 0 : index
    %c0_30 = arith.constant 0 : index
    %55 = vector.load %arg4[%c0_28, %c2, %c0_29, %c0_30] : memref<2x3x32x32xf32, #tpu.memory_space<vmem>>, vector<1x1x32x32xf32>
    %56 = vector.shape_cast %55 : vector<1x1x32x32xf32> to vector<32x32xf32>
    %cst_31 = arith.constant dense<0.000000e+00> : vector<8x32xf32>
    %57 = tpu.matmul %25, %56, %cst_31 {dimension_numbers = #tpu.dot_dimension_numbers<[1], [0], [0], [1], [0, 0, 1, 1], [], []>} : vector<8x32xf32>, vector<32x32xf32>, vector<8x32xf32> -> vector<8x32xf32>
    %c0_32 = arith.constant 0 : index
    %c2_33 = arith.constant 2 : index
    %c0_34 = arith.constant 0 : index
    %c0_35 = arith.constant 0 : index
    %58 = vector.load %arg5[%c0_32, %c2_33, %c0_34, %c0_35] : memref<2x3x1x32xf32, #tpu.memory_space<vmem>>, vector<1x1x1x32xf32>
    %59 = vector.shape_cast %58 : vector<1x1x1x32xf32> to vector<1x32xf32>
    %60 = vector.broadcast %59 : vector<1x32xf32> to vector<8x32xf32>
    %61 = arith.addf %57, %60 : vector<8x32xf32>
    %cst_36 = arith.constant 0.000000e+00 : f32
    %62 = vector.broadcast %cst_36 : f32 to vector<8x32xf32>
    %63 = vector.broadcast %33 : vector<1x32xf32> to vector<8x32xf32>
    %64 = arith.mulf %47, %63 : vector<8x32xf32>
    %cst_37 = arith.constant dense<0.000000e+00> : vector<8x8xf32>
    %65 = tpu.matmul %64, %54, %cst_37 {dimension_numbers = #tpu.dot_dimension_numbers<[1], [1], [0], [0], [0, 0, 1, 0], [], []>} : vector<8x32xf32>, vector<8x32xf32>, vector<8x8xf32> -> vector<8x8xf32>
    %cst_38 = arith.constant 2.500000e-01 : f32
    %66 = vector.broadcast %cst_38 : f32 to vector<8x8xf32>
    %67 = arith.mulf %65, %66 : vector<8x8xf32>
    %cst_39 = arith.constant dense<0xFF800000> : vector<8xf32>
    %68 = vector.multi_reduction <maximumf>, %67, %cst_39 [1] : vector<8x8xf32> to vector<8xf32>
    %69 = vector.shape_cast %68 : vector<8xf32> to vector<8x1xf32>
    %70 = vector.broadcast %69 : vector<8x1xf32> to vector<8x8xf32>
    %71 = arith.subf %67, %70 : vector<8x8xf32>
    %72 = math.exp %71 : vector<8x8xf32>
    %cst_40 = arith.constant dense<0.000000e+00> : vector<8xf32>
    %73 = vector.multi_reduction <add>, %72, %cst_40 [1] : vector<8x8xf32> to vector<8xf32>
    %74 = vector.shape_cast %73 : vector<8xf32> to vector<8x1xf32>
    %75 = tpu.reciprocal %74 {approx = true} : vector<8x1xf32> -> vector<8x1xf32>
    %76 = vector.broadcast %75 : vector<8x1xf32> to vector<8x8xf32>
    %77 = arith.mulf %72, %76 : vector<8x8xf32>
    %78 = vector.broadcast %33 : vector<1x32xf32> to vector<8x32xf32>
    %79 = arith.mulf %61, %78 : vector<8x32xf32>
    %cst_41 = arith.constant dense<0.000000e+00> : vector<8x32xf32>
    %80 = tpu.matmul %77, %79, %cst_41 {dimension_numbers = #tpu.dot_dimension_numbers<[1], [0], [0], [1], [0, 0, 1, 1], [], []>} : vector<8x8xf32>, vector<8x32xf32>, vector<8x32xf32> -> vector<8x32xf32>
    %81 = arith.addf %62, %80 : vector<8x32xf32>
    %82 = vector.broadcast %40 : vector<1x32xf32> to vector<8x32xf32>
    %83 = arith.mulf %47, %82 : vector<8x32xf32>
    %cst_42 = arith.constant dense<0.000000e+00> : vector<8x8xf32>
    %84 = tpu.matmul %83, %54, %cst_42 {dimension_numbers = #tpu.dot_dimension_numbers<[1], [1], [0], [0], [0, 0, 1, 0], [], []>} : vector<8x32xf32>, vector<8x32xf32>, vector<8x8xf32> -> vector<8x8xf32>
    %cst_43 = arith.constant 2.500000e-01 : f32
    %85 = vector.broadcast %cst_43 : f32 to vector<8x8xf32>
    %86 = arith.mulf %84, %85 : vector<8x8xf32>
    %cst_44 = arith.constant dense<0xFF800000> : vector<8xf32>
    %87 = vector.multi_reduction <maximumf>, %86, %cst_44 [1] : vector<8x8xf32> to vector<8xf32>
    %88 = vector.shape_cast %87 : vector<8xf32> to vector<8x1xf32>
    %89 = vector.broadcast %88 : vector<8x1xf32> to vector<8x8xf32>
    %90 = arith.subf %86, %89 : vector<8x8xf32>
    %91 = math.exp %90 : vector<8x8xf32>
    %cst_45 = arith.constant dense<0.000000e+00> : vector<8xf32>
    %92 = vector.multi_reduction <add>, %91, %cst_45 [1] : vector<8x8xf32> to vector<8xf32>
    %93 = vector.shape_cast %92 : vector<8xf32> to vector<8x1xf32>
    %94 = tpu.reciprocal %93 {approx = true} : vector<8x1xf32> -> vector<8x1xf32>
    %95 = vector.broadcast %94 : vector<8x1xf32> to vector<8x8xf32>
    %96 = arith.mulf %91, %95 : vector<8x8xf32>
    %97 = vector.broadcast %40 : vector<1x32xf32> to vector<8x32xf32>
    %98 = arith.mulf %61, %97 : vector<8x32xf32>
    %cst_46 = arith.constant dense<0.000000e+00> : vector<8x32xf32>
    %99 = tpu.matmul %96, %98, %cst_46 {dimension_numbers = #tpu.dot_dimension_numbers<[1], [0], [0], [1], [0, 0, 1, 1], [], []>} : vector<8x8xf32>, vector<8x32xf32>, vector<8x32xf32> -> vector<8x32xf32>
    %100 = arith.addf %81, %99 : vector<8x32xf32>
    %c0_47 = arith.constant 0 : index
    %c0_48 = arith.constant 0 : index
    %c0_49 = arith.constant 0 : index
    %101 = vector.load %arg6[%c0_47, %c0_48, %c0_49] : memref<2x32x32xf32, #tpu.memory_space<vmem>>, vector<1x32x32xf32>
    %102 = vector.shape_cast %101 : vector<1x32x32xf32> to vector<32x32xf32>
    %cst_50 = arith.constant dense<0.000000e+00> : vector<8x32xf32>
    %103 = tpu.matmul %100, %102, %cst_50 {dimension_numbers = #tpu.dot_dimension_numbers<[1], [0], [0], [1], [0, 0, 1, 1], [], []>} : vector<8x32xf32>, vector<32x32xf32>, vector<8x32xf32> -> vector<8x32xf32>
    %c0_51 = arith.constant 0 : index
    %c0_52 = arith.constant 0 : index
    %c0_53 = arith.constant 0 : index
    %104 = vector.load %arg7[%c0_51, %c0_52, %c0_53] : memref<2x1x32xf32, #tpu.memory_space<vmem>>, vector<1x1x32xf32>
    %105 = vector.shape_cast %104 : vector<1x1x32xf32> to vector<1x32xf32>
    %106 = vector.broadcast %105 : vector<1x32xf32> to vector<8x32xf32>
    %107 = arith.addf %103, %106 : vector<8x32xf32>
    %108 = arith.addf %25, %107 : vector<8x32xf32>
    %c0_54 = arith.constant 0 : index
    %c0_55 = arith.constant 0 : index
    %c0_56 = arith.constant 0 : index
    %109 = vector.load %arg8[%c0_54, %c0_55, %c0_56] : memref<2x1x32xf32, #tpu.memory_space<vmem>>, vector<1x1x32xf32>
    %110 = vector.shape_cast %109 : vector<1x1x32xf32> to vector<1x32xf32>
    %c0_57 = arith.constant 0 : index
    %c0_58 = arith.constant 0 : index
    %c0_59 = arith.constant 0 : index
    %111 = vector.load %arg9[%c0_57, %c0_58, %c0_59] : memref<2x1x32xf32, #tpu.memory_space<vmem>>, vector<1x1x32xf32>
    %112 = vector.shape_cast %111 : vector<1x1x32xf32> to vector<1x32xf32>
    %cst_60 = arith.constant dense<0.000000e+00> : vector<8xf32>
    %113 = vector.multi_reduction <add>, %108, %cst_60 [1] : vector<8x32xf32> to vector<8xf32>
    %114 = vector.shape_cast %113 : vector<8xf32> to vector<8x1xf32>
    %cst_61 = arith.constant 3.200000e+01 : f32
    %115 = vector.broadcast %cst_61 : f32 to vector<8x1xf32>
    %116 = arith.divf %114, %115 : vector<8x1xf32>
    %117 = vector.broadcast %116 : vector<8x1xf32> to vector<8x32xf32>
    %118 = arith.subf %108, %117 : vector<8x32xf32>
    %119 = arith.mulf %118, %118 : vector<8x32xf32>
    %cst_62 = arith.constant dense<0.000000e+00> : vector<8xf32>
    %120 = vector.multi_reduction <add>, %119, %cst_62 [1] : vector<8x32xf32> to vector<8xf32>
    %121 = vector.shape_cast %120 : vector<8xf32> to vector<8x1xf32>
    %cst_63 = arith.constant 3.200000e+01 : f32
    %122 = vector.broadcast %cst_63 : f32 to vector<8x1xf32>
    %123 = arith.divf %121, %122 : vector<8x1xf32>
    %124 = vector.broadcast %116 : vector<8x1xf32> to vector<8x32xf32>
    %125 = arith.subf %108, %124 : vector<8x32xf32>
    %cst_64 = arith.constant 9.99999996E-13 : f32
    %126 = vector.broadcast %cst_64 : f32 to vector<8x1xf32>
    %127 = arith.addf %123, %126 : vector<8x1xf32>
    %128 = math.rsqrt %127 : vector<8x1xf32>
    %129 = vector.broadcast %128 : vector<8x1xf32> to vector<8x32xf32>
    %130 = arith.mulf %125, %129 : vector<8x32xf32>
    %131 = vector.broadcast %110 : vector<1x32xf32> to vector<8x32xf32>
    %132 = arith.mulf %130, %131 : vector<8x32xf32>
    %133 = vector.broadcast %112 : vector<1x32xf32> to vector<8x32xf32>
    %134 = arith.addf %132, %133 : vector<8x32xf32>
    %c0_65 = arith.constant 0 : index
    %c0_66 = arith.constant 0 : index
    %c0_67 = arith.constant 0 : index
    %135 = vector.load %arg10[%c0_65, %c0_66, %c0_67] : memref<2x32x64xf32, #tpu.memory_space<vmem>>, vector<1x32x64xf32>
    %136 = vector.shape_cast %135 : vector<1x32x64xf32> to vector<32x64xf32>
    %cst_68 = arith.constant dense<0.000000e+00> : vector<8x64xf32>
    %137 = tpu.matmul %134, %136, %cst_68 {dimension_numbers = #tpu.dot_dimension_numbers<[1], [0], [0], [1], [0, 0, 1, 1], [], []>} : vector<8x32xf32>, vector<32x64xf32>, vector<8x64xf32> -> vector<8x64xf32>
    %c0_69 = arith.constant 0 : index
    %c0_70 = arith.constant 0 : index
    %c0_71 = arith.constant 0 : index
    %138 = vector.load %arg11[%c0_69, %c0_70, %c0_71] : memref<2x1x64xf32, #tpu.memory_space<vmem>>, vector<1x1x64xf32>
    %139 = vector.shape_cast %138 : vector<1x1x64xf32> to vector<1x64xf32>
    %140 = vector.broadcast %139 : vector<1x64xf32> to vector<8x64xf32>
    %141 = arith.addf %137, %140 : vector<8x64xf32>
    %cst_72 = arith.constant 5.000000e-01 : f32
    %142 = vector.broadcast %cst_72 : f32 to vector<8x64xf32>
    %143 = arith.mulf %142, %141 : vector<8x64xf32>
    %cst_73 = arith.constant 0.707106769 : f32
    %144 = vector.broadcast %cst_73 : f32 to vector<8x64xf32>
    %145 = arith.mulf %141, %144 : vector<8x64xf32>
    %146 = math.absf %145 : vector<8x64xf32>
    %cst_74 = arith.constant 0.327591091 : f32
    %147 = vector.broadcast %cst_74 : f32 to vector<8x64xf32>
    %148 = arith.mulf %147, %146 : vector<8x64xf32>
    %cst_75 = arith.constant 1.000000e+00 : f32
    %149 = vector.broadcast %cst_75 : f32 to vector<8x64xf32>
    %150 = arith.addf %149, %148 : vector<8x64xf32>
    %cst_76 = arith.constant 1.000000e+00 : f32
    %151 = vector.broadcast %cst_76 : f32 to vector<8x64xf32>
    %152 = arith.divf %151, %150 : vector<8x64xf32>
    %cst_77 = arith.constant 1.06140542 : f32
    %153 = vector.broadcast %cst_77 : f32 to vector<8x64xf32>
    %154 = arith.mulf %153, %152 : vector<8x64xf32>
    %cst_78 = arith.constant 1.45315206 : f32
    %155 = vector.broadcast %cst_78 : f32 to vector<8x64xf32>
    %156 = arith.subf %154, %155 : vector<8x64xf32>
    %157 = arith.mulf %156, %152 : vector<8x64xf32>
    %cst_79 = arith.constant 1.42141378 : f32
    %158 = vector.broadcast %cst_79 : f32 to vector<8x64xf32>
    %159 = arith.addf %157, %158 : vector<8x64xf32>
    %160 = arith.mulf %159, %152 : vector<8x64xf32>
    %cst_80 = arith.constant 0.284496725 : f32
    %161 = vector.broadcast %cst_80 : f32 to vector<8x64xf32>
    %162 = arith.subf %160, %161 : vector<8x64xf32>
    %163 = arith.mulf %162, %152 : vector<8x64xf32>
    %cst_81 = arith.constant 0.254829586 : f32
    %164 = vector.broadcast %cst_81 : f32 to vector<8x64xf32>
    %165 = arith.addf %163, %164 : vector<8x64xf32>
    %166 = arith.mulf %165, %152 : vector<8x64xf32>
    %cst_82 = arith.constant 0.000000e+00 : f32
    %167 = vector.broadcast %cst_82 : f32 to vector<8x64xf32>
    %168 = arith.subf %167, %146 : vector<8x64xf32>
    %169 = arith.mulf %168, %146 : vector<8x64xf32>
    %170 = math.exp %169 : vector<8x64xf32>
    %171 = arith.mulf %166, %170 : vector<8x64xf32>
    %cst_83 = arith.constant 1.000000e+00 : f32
    %172 = vector.broadcast %cst_83 : f32 to vector<8x64xf32>
    %173 = arith.subf %172, %171 : vector<8x64xf32>
    %cst_84 = arith.constant 0.000000e+00 : f32
    %174 = vector.broadcast %cst_84 : f32 to vector<8x64xf32>
    %175 = arith.cmpf olt, %145, %174 : vector<8x64xf32>
    %cst_85 = arith.constant 0.000000e+00 : f32
    %176 = vector.broadcast %cst_85 : f32 to vector<8x64xf32>
    %177 = arith.subf %176, %173 : vector<8x64xf32>
    %178 = arith.select %175, %177, %173 : vector<8x64xi1>, vector<8x64xf32>
    %cst_86 = arith.constant 1.000000e+00 : f32
    %179 = vector.broadcast %cst_86 : f32 to vector<8x64xf32>
    %180 = arith.addf %179, %178 : vector<8x64xf32>
    %181 = arith.mulf %143, %180 : vector<8x64xf32>
    %c0_87 = arith.constant 0 : index
    %c0_88 = arith.constant 0 : index
    %c0_89 = arith.constant 0 : index
    %182 = vector.load %arg12[%c0_87, %c0_88, %c0_89] : memref<2x64x32xf32, #tpu.memory_space<vmem>>, vector<1x64x32xf32>
    %183 = vector.shape_cast %182 : vector<1x64x32xf32> to vector<64x32xf32>
    %cst_90 = arith.constant dense<0.000000e+00> : vector<8x32xf32>
    %184 = tpu.matmul %181, %183, %cst_90 {dimension_numbers = #tpu.dot_dimension_numbers<[1], [0], [0], [1], [0, 0, 1, 1], [], []>} : vector<8x64xf32>, vector<64x32xf32>, vector<8x32xf32> -> vector<8x32xf32>
    %c0_91 = arith.constant 0 : index
    %c0_92 = arith.constant 0 : index
    %c0_93 = arith.constant 0 : index
    %185 = vector.load %arg13[%c0_91, %c0_92, %c0_93] : memref<2x1x32xf32, #tpu.memory_space<vmem>>, vector<1x1x32xf32>
    %186 = vector.shape_cast %185 : vector<1x1x32xf32> to vector<1x32xf32>
    %187 = vector.broadcast %186 : vector<1x32xf32> to vector<8x32xf32>
    %188 = arith.addf %184, %187 : vector<8x32xf32>
    %189 = arith.addf %134, %188 : vector<8x32xf32>
    %c0_94 = arith.constant 0 : index
    %c0_95 = arith.constant 0 : index
    %c0_96 = arith.constant 0 : index
    %190 = vector.load %arg14[%c0_94, %c0_95, %c0_96] : memref<2x1x32xf32, #tpu.memory_space<vmem>>, vector<1x1x32xf32>
    %191 = vector.shape_cast %190 : vector<1x1x32xf32> to vector<1x32xf32>
    %c0_97 = arith.constant 0 : index
    %c0_98 = arith.constant 0 : index
    %c0_99 = arith.constant 0 : index
    %192 = vector.load %arg15[%c0_97, %c0_98, %c0_99] : memref<2x1x32xf32, #tpu.memory_space<vmem>>, vector<1x1x32xf32>
    %193 = vector.shape_cast %192 : vector<1x1x32xf32> to vector<1x32xf32>
    %cst_100 = arith.constant dense<0.000000e+00> : vector<8xf32>
    %194 = vector.multi_reduction <add>, %189, %cst_100 [1] : vector<8x32xf32> to vector<8xf32>
    %195 = vector.shape_cast %194 : vector<8xf32> to vector<8x1xf32>
    %cst_101 = arith.constant 3.200000e+01 : f32
    %196 = vector.broadcast %cst_101 : f32 to vector<8x1xf32>
    %197 = arith.divf %195, %196 : vector<8x1xf32>
    %198 = vector.broadcast %197 : vector<8x1xf32> to vector<8x32xf32>
    %199 = arith.subf %189, %198 : vector<8x32xf32>
    %200 = arith.mulf %199, %199 : vector<8x32xf32>
    %cst_102 = arith.constant dense<0.000000e+00> : vector<8xf32>
    %201 = vector.multi_reduction <add>, %200, %cst_102 [1] : vector<8x32xf32> to vector<8xf32>
    %202 = vector.shape_cast %201 : vector<8xf32> to vector<8x1xf32>
    %cst_103 = arith.constant 3.200000e+01 : f32
    %203 = vector.broadcast %cst_103 : f32 to vector<8x1xf32>
    %204 = arith.divf %202, %203 : vector<8x1xf32>
    %205 = vector.broadcast %197 : vector<8x1xf32> to vector<8x32xf32>
    %206 = arith.subf %189, %205 : vector<8x32xf32>
    %cst_104 = arith.constant 9.99999996E-13 : f32
    %207 = vector.broadcast %cst_104 : f32 to vector<8x1xf32>
    %208 = arith.addf %204, %207 : vector<8x1xf32>
    %209 = math.rsqrt %208 : vector<8x1xf32>
    %210 = vector.broadcast %209 : vector<8x1xf32> to vector<8x32xf32>
    %211 = arith.mulf %206, %210 : vector<8x32xf32>
    %212 = vector.broadcast %191 : vector<1x32xf32> to vector<8x32xf32>
    %213 = arith.mulf %211, %212 : vector<8x32xf32>
    %214 = vector.broadcast %193 : vector<1x32xf32> to vector<8x32xf32>
    %215 = arith.addf %213, %214 : vector<8x32xf32>
    %c1_105 = arith.constant 1 : index
    %c0_106 = arith.constant 0 : index
    %c0_107 = arith.constant 0 : index
    %c0_108 = arith.constant 0 : index
    %216 = vector.load %arg4[%c1_105, %c0_106, %c0_107, %c0_108] : memref<2x3x32x32xf32, #tpu.memory_space<vmem>>, vector<1x1x32x32xf32>
    %217 = vector.shape_cast %216 : vector<1x1x32x32xf32> to vector<32x32xf32>
    %cst_109 = arith.constant dense<0.000000e+00> : vector<8x32xf32>
    %218 = tpu.matmul %215, %217, %cst_109 {dimension_numbers = #tpu.dot_dimension_numbers<[1], [0], [0], [1], [0, 0, 1, 1], [], []>} : vector<8x32xf32>, vector<32x32xf32>, vector<8x32xf32> -> vector<8x32xf32>
    %c1_110 = arith.constant 1 : index
    %c0_111 = arith.constant 0 : index
    %c0_112 = arith.constant 0 : index
    %c0_113 = arith.constant 0 : index
    %219 = vector.load %arg5[%c1_110, %c0_111, %c0_112, %c0_113] : memref<2x3x1x32xf32, #tpu.memory_space<vmem>>, vector<1x1x1x32xf32>
    %220 = vector.shape_cast %219 : vector<1x1x1x32xf32> to vector<1x32xf32>
    %221 = vector.broadcast %220 : vector<1x32xf32> to vector<8x32xf32>
    %222 = arith.addf %218, %221 : vector<8x32xf32>
    %c1_114 = arith.constant 1 : index
    %c1_115 = arith.constant 1 : index
    %c0_116 = arith.constant 0 : index
    %c0_117 = arith.constant 0 : index
    %223 = vector.load %arg4[%c1_114, %c1_115, %c0_116, %c0_117] : memref<2x3x32x32xf32, #tpu.memory_space<vmem>>, vector<1x1x32x32xf32>
    %224 = vector.shape_cast %223 : vector<1x1x32x32xf32> to vector<32x32xf32>
    %cst_118 = arith.constant dense<0.000000e+00> : vector<8x32xf32>
    %225 = tpu.matmul %215, %224, %cst_118 {dimension_numbers = #tpu.dot_dimension_numbers<[1], [0], [0], [1], [0, 0, 1, 1], [], []>} : vector<8x32xf32>, vector<32x32xf32>, vector<8x32xf32> -> vector<8x32xf32>
    %c1_119 = arith.constant 1 : index
    %c1_120 = arith.constant 1 : index
    %c0_121 = arith.constant 0 : index
    %c0_122 = arith.constant 0 : index
    %226 = vector.load %arg5[%c1_119, %c1_120, %c0_121, %c0_122] : memref<2x3x1x32xf32, #tpu.memory_space<vmem>>, vector<1x1x1x32xf32>
    %227 = vector.shape_cast %226 : vector<1x1x1x32xf32> to vector<1x32xf32>
    %228 = vector.broadcast %227 : vector<1x32xf32> to vector<8x32xf32>
    %229 = arith.addf %225, %228 : vector<8x32xf32>
    %c1_123 = arith.constant 1 : index
    %c2_124 = arith.constant 2 : index
    %c0_125 = arith.constant 0 : index
    %c0_126 = arith.constant 0 : index
    %230 = vector.load %arg4[%c1_123, %c2_124, %c0_125, %c0_126] : memref<2x3x32x32xf32, #tpu.memory_space<vmem>>, vector<1x1x32x32xf32>
    %231 = vector.shape_cast %230 : vector<1x1x32x32xf32> to vector<32x32xf32>
    %cst_127 = arith.constant dense<0.000000e+00> : vector<8x32xf32>
    %232 = tpu.matmul %215, %231, %cst_127 {dimension_numbers = #tpu.dot_dimension_numbers<[1], [0], [0], [1], [0, 0, 1, 1], [], []>} : vector<8x32xf32>, vector<32x32xf32>, vector<8x32xf32> -> vector<8x32xf32>
    %c1_128 = arith.constant 1 : index
    %c2_129 = arith.constant 2 : index
    %c0_130 = arith.constant 0 : index
    %c0_131 = arith.constant 0 : index
    %233 = vector.load %arg5[%c1_128, %c2_129, %c0_130, %c0_131] : memref<2x3x1x32xf32, #tpu.memory_space<vmem>>, vector<1x1x1x32xf32>
    %234 = vector.shape_cast %233 : vector<1x1x1x32xf32> to vector<1x32xf32>
    %235 = vector.broadcast %234 : vector<1x32xf32> to vector<8x32xf32>
    %236 = arith.addf %232, %235 : vector<8x32xf32>
    %cst_132 = arith.constant 0.000000e+00 : f32
    %237 = vector.broadcast %cst_132 : f32 to vector<8x32xf32>
    %238 = vector.broadcast %33 : vector<1x32xf32> to vector<8x32xf32>
    %239 = arith.mulf %222, %238 : vector<8x32xf32>
    %cst_133 = arith.constant dense<0.000000e+00> : vector<8x8xf32>
    %240 = tpu.matmul %239, %229, %cst_133 {dimension_numbers = #tpu.dot_dimension_numbers<[1], [1], [0], [0], [0, 0, 1, 0], [], []>} : vector<8x32xf32>, vector<8x32xf32>, vector<8x8xf32> -> vector<8x8xf32>
    %cst_134 = arith.constant 2.500000e-01 : f32
    %241 = vector.broadcast %cst_134 : f32 to vector<8x8xf32>
    %242 = arith.mulf %240, %241 : vector<8x8xf32>
    %cst_135 = arith.constant dense<0xFF800000> : vector<8xf32>
    %243 = vector.multi_reduction <maximumf>, %242, %cst_135 [1] : vector<8x8xf32> to vector<8xf32>
    %244 = vector.shape_cast %243 : vector<8xf32> to vector<8x1xf32>
    %245 = vector.broadcast %244 : vector<8x1xf32> to vector<8x8xf32>
    %246 = arith.subf %242, %245 : vector<8x8xf32>
    %247 = math.exp %246 : vector<8x8xf32>
    %cst_136 = arith.constant dense<0.000000e+00> : vector<8xf32>
    %248 = vector.multi_reduction <add>, %247, %cst_136 [1] : vector<8x8xf32> to vector<8xf32>
    %249 = vector.shape_cast %248 : vector<8xf32> to vector<8x1xf32>
    %250 = tpu.reciprocal %249 {approx = true} : vector<8x1xf32> -> vector<8x1xf32>
    %251 = vector.broadcast %250 : vector<8x1xf32> to vector<8x8xf32>
    %252 = arith.mulf %247, %251 : vector<8x8xf32>
    %253 = vector.broadcast %33 : vector<1x32xf32> to vector<8x32xf32>
    %254 = arith.mulf %236, %253 : vector<8x32xf32>
    %cst_137 = arith.constant dense<0.000000e+00> : vector<8x32xf32>
    %255 = tpu.matmul %252, %254, %cst_137 {dimension_numbers = #tpu.dot_dimension_numbers<[1], [0], [0], [1], [0, 0, 1, 1], [], []>} : vector<8x8xf32>, vector<8x32xf32>, vector<8x32xf32> -> vector<8x32xf32>
    %256 = arith.addf %237, %255 : vector<8x32xf32>
    %257 = vector.broadcast %40 : vector<1x32xf32> to vector<8x32xf32>
    %258 = arith.mulf %222, %257 : vector<8x32xf32>
    %cst_138 = arith.constant dense<0.000000e+00> : vector<8x8xf32>
    %259 = tpu.matmul %258, %229, %cst_138 {dimension_numbers = #tpu.dot_dimension_numbers<[1], [1], [0], [0], [0, 0, 1, 0], [], []>} : vector<8x32xf32>, vector<8x32xf32>, vector<8x8xf32> -> vector<8x8xf32>
    %cst_139 = arith.constant 2.500000e-01 : f32
    %260 = vector.broadcast %cst_139 : f32 to vector<8x8xf32>
    %261 = arith.mulf %259, %260 : vector<8x8xf32>
    %cst_140 = arith.constant dense<0xFF800000> : vector<8xf32>
    %262 = vector.multi_reduction <maximumf>, %261, %cst_140 [1] : vector<8x8xf32> to vector<8xf32>
    %263 = vector.shape_cast %262 : vector<8xf32> to vector<8x1xf32>
    %264 = vector.broadcast %263 : vector<8x1xf32> to vector<8x8xf32>
    %265 = arith.subf %261, %264 : vector<8x8xf32>
    %266 = math.exp %265 : vector<8x8xf32>
    %cst_141 = arith.constant dense<0.000000e+00> : vector<8xf32>
    %267 = vector.multi_reduction <add>, %266, %cst_141 [1] : vector<8x8xf32> to vector<8xf32>
    %268 = vector.shape_cast %267 : vector<8xf32> to vector<8x1xf32>
    %269 = tpu.reciprocal %268 {approx = true} : vector<8x1xf32> -> vector<8x1xf32>
    %270 = vector.broadcast %269 : vector<8x1xf32> to vector<8x8xf32>
    %271 = arith.mulf %266, %270 : vector<8x8xf32>
    %272 = vector.broadcast %40 : vector<1x32xf32> to vector<8x32xf32>
    %273 = arith.mulf %236, %272 : vector<8x32xf32>
    %cst_142 = arith.constant dense<0.000000e+00> : vector<8x32xf32>
    %274 = tpu.matmul %271, %273, %cst_142 {dimension_numbers = #tpu.dot_dimension_numbers<[1], [0], [0], [1], [0, 0, 1, 1], [], []>} : vector<8x8xf32>, vector<8x32xf32>, vector<8x32xf32> -> vector<8x32xf32>
    %275 = arith.addf %256, %274 : vector<8x32xf32>
    %c1_143 = arith.constant 1 : index
    %c0_144 = arith.constant 0 : index
    %c0_145 = arith.constant 0 : index
    %276 = vector.load %arg6[%c1_143, %c0_144, %c0_145] : memref<2x32x32xf32, #tpu.memory_space<vmem>>, vector<1x32x32xf32>
    %277 = vector.shape_cast %276 : vector<1x32x32xf32> to vector<32x32xf32>
    %cst_146 = arith.constant dense<0.000000e+00> : vector<8x32xf32>
    %278 = tpu.matmul %275, %277, %cst_146 {dimension_numbers = #tpu.dot_dimension_numbers<[1], [0], [0], [1], [0, 0, 1, 1], [], []>} : vector<8x32xf32>, vector<32x32xf32>, vector<8x32xf32> -> vector<8x32xf32>
    %c1_147 = arith.constant 1 : index
    %c0_148 = arith.constant 0 : index
    %c0_149 = arith.constant 0 : index
    %279 = vector.load %arg7[%c1_147, %c0_148, %c0_149] : memref<2x1x32xf32, #tpu.memory_space<vmem>>, vector<1x1x32xf32>
    %280 = vector.shape_cast %279 : vector<1x1x32xf32> to vector<1x32xf32>
    %281 = vector.broadcast %280 : vector<1x32xf32> to vector<8x32xf32>
    %282 = arith.addf %278, %281 : vector<8x32xf32>
    %283 = arith.addf %215, %282 : vector<8x32xf32>
    %c1_150 = arith.constant 1 : index
    %c0_151 = arith.constant 0 : index
    %c0_152 = arith.constant 0 : index
    %284 = vector.load %arg8[%c1_150, %c0_151, %c0_152] : memref<2x1x32xf32, #tpu.memory_space<vmem>>, vector<1x1x32xf32>
    %285 = vector.shape_cast %284 : vector<1x1x32xf32> to vector<1x32xf32>
    %c1_153 = arith.constant 1 : index
    %c0_154 = arith.constant 0 : index
    %c0_155 = arith.constant 0 : index
    %286 = vector.load %arg9[%c1_153, %c0_154, %c0_155] : memref<2x1x32xf32, #tpu.memory_space<vmem>>, vector<1x1x32xf32>
    %287 = vector.shape_cast %286 : vector<1x1x32xf32> to vector<1x32xf32>
    %cst_156 = arith.constant dense<0.000000e+00> : vector<8xf32>
    %288 = vector.multi_reduction <add>, %283, %cst_156 [1] : vector<8x32xf32> to vector<8xf32>
    %289 = vector.shape_cast %288 : vector<8xf32> to vector<8x1xf32>
    %cst_157 = arith.constant 3.200000e+01 : f32
    %290 = vector.broadcast %cst_157 : f32 to vector<8x1xf32>
    %291 = arith.divf %289, %290 : vector<8x1xf32>
    %292 = vector.broadcast %291 : vector<8x1xf32> to vector<8x32xf32>
    %293 = arith.subf %283, %292 : vector<8x32xf32>
    %294 = arith.mulf %293, %293 : vector<8x32xf32>
    %cst_158 = arith.constant dense<0.000000e+00> : vector<8xf32>
    %295 = vector.multi_reduction <add>, %294, %cst_158 [1] : vector<8x32xf32> to vector<8xf32>
    %296 = vector.shape_cast %295 : vector<8xf32> to vector<8x1xf32>
    %cst_159 = arith.constant 3.200000e+01 : f32
    %297 = vector.broadcast %cst_159 : f32 to vector<8x1xf32>
    %298 = arith.divf %296, %297 : vector<8x1xf32>
    %299 = vector.broadcast %291 : vector<8x1xf32> to vector<8x32xf32>
    %300 = arith.subf %283, %299 : vector<8x32xf32>
    %cst_160 = arith.constant 9.99999996E-13 : f32
    %301 = vector.broadcast %cst_160 : f32 to vector<8x1xf32>
    %302 = arith.addf %298, %301 : vector<8x1xf32>
    %303 = math.rsqrt %302 : vector<8x1xf32>
    %304 = vector.broadcast %303 : vector<8x1xf32> to vector<8x32xf32>
    %305 = arith.mulf %300, %304 : vector<8x32xf32>
    %306 = vector.broadcast %285 : vector<1x32xf32> to vector<8x32xf32>
    %307 = arith.mulf %305, %306 : vector<8x32xf32>
    %308 = vector.broadcast %287 : vector<1x32xf32> to vector<8x32xf32>
    %309 = arith.addf %307, %308 : vector<8x32xf32>
    %c1_161 = arith.constant 1 : index
    %c0_162 = arith.constant 0 : index
    %c0_163 = arith.constant 0 : index
    %310 = vector.load %arg10[%c1_161, %c0_162, %c0_163] : memref<2x32x64xf32, #tpu.memory_space<vmem>>, vector<1x32x64xf32>
    %311 = vector.shape_cast %310 : vector<1x32x64xf32> to vector<32x64xf32>
    %cst_164 = arith.constant dense<0.000000e+00> : vector<8x64xf32>
    %312 = tpu.matmul %309, %311, %cst_164 {dimension_numbers = #tpu.dot_dimension_numbers<[1], [0], [0], [1], [0, 0, 1, 1], [], []>} : vector<8x32xf32>, vector<32x64xf32>, vector<8x64xf32> -> vector<8x64xf32>
    %c1_165 = arith.constant 1 : index
    %c0_166 = arith.constant 0 : index
    %c0_167 = arith.constant 0 : index
    %313 = vector.load %arg11[%c1_165, %c0_166, %c0_167] : memref<2x1x64xf32, #tpu.memory_space<vmem>>, vector<1x1x64xf32>
    %314 = vector.shape_cast %313 : vector<1x1x64xf32> to vector<1x64xf32>
    %315 = vector.broadcast %314 : vector<1x64xf32> to vector<8x64xf32>
    %316 = arith.addf %312, %315 : vector<8x64xf32>
    %cst_168 = arith.constant 5.000000e-01 : f32
    %317 = vector.broadcast %cst_168 : f32 to vector<8x64xf32>
    %318 = arith.mulf %317, %316 : vector<8x64xf32>
    %cst_169 = arith.constant 0.707106769 : f32
    %319 = vector.broadcast %cst_169 : f32 to vector<8x64xf32>
    %320 = arith.mulf %316, %319 : vector<8x64xf32>
    %321 = math.absf %320 : vector<8x64xf32>
    %cst_170 = arith.constant 0.327591091 : f32
    %322 = vector.broadcast %cst_170 : f32 to vector<8x64xf32>
    %323 = arith.mulf %322, %321 : vector<8x64xf32>
    %cst_171 = arith.constant 1.000000e+00 : f32
    %324 = vector.broadcast %cst_171 : f32 to vector<8x64xf32>
    %325 = arith.addf %324, %323 : vector<8x64xf32>
    %cst_172 = arith.constant 1.000000e+00 : f32
    %326 = vector.broadcast %cst_172 : f32 to vector<8x64xf32>
    %327 = arith.divf %326, %325 : vector<8x64xf32>
    %cst_173 = arith.constant 1.06140542 : f32
    %328 = vector.broadcast %cst_173 : f32 to vector<8x64xf32>
    %329 = arith.mulf %328, %327 : vector<8x64xf32>
    %cst_174 = arith.constant 1.45315206 : f32
    %330 = vector.broadcast %cst_174 : f32 to vector<8x64xf32>
    %331 = arith.subf %329, %330 : vector<8x64xf32>
    %332 = arith.mulf %331, %327 : vector<8x64xf32>
    %cst_175 = arith.constant 1.42141378 : f32
    %333 = vector.broadcast %cst_175 : f32 to vector<8x64xf32>
    %334 = arith.addf %332, %333 : vector<8x64xf32>
    %335 = arith.mulf %334, %327 : vector<8x64xf32>
    %cst_176 = arith.constant 0.284496725 : f32
    %336 = vector.broadcast %cst_176 : f32 to vector<8x64xf32>
    %337 = arith.subf %335, %336 : vector<8x64xf32>
    %338 = arith.mulf %337, %327 : vector<8x64xf32>
    %cst_177 = arith.constant 0.254829586 : f32
    %339 = vector.broadcast %cst_177 : f32 to vector<8x64xf32>
    %340 = arith.addf %338, %339 : vector<8x64xf32>
    %341 = arith.mulf %340, %327 : vector<8x64xf32>
    %cst_178 = arith.constant 0.000000e+00 : f32
    %342 = vector.broadcast %cst_178 : f32 to vector<8x64xf32>
    %343 = arith.subf %342, %321 : vector<8x64xf32>
    %344 = arith.mulf %343, %321 : vector<8x64xf32>
    %345 = math.exp %344 : vector<8x64xf32>
    %346 = arith.mulf %341, %345 : vector<8x64xf32>
    %cst_179 = arith.constant 1.000000e+00 : f32
    %347 = vector.broadcast %cst_179 : f32 to vector<8x64xf32>
    %348 = arith.subf %347, %346 : vector<8x64xf32>
    %cst_180 = arith.constant 0.000000e+00 : f32
    %349 = vector.broadcast %cst_180 : f32 to vector<8x64xf32>
    %350 = arith.cmpf olt, %320, %349 : vector<8x64xf32>
    %cst_181 = arith.constant 0.000000e+00 : f32
    %351 = vector.broadcast %cst_181 : f32 to vector<8x64xf32>
    %352 = arith.subf %351, %348 : vector<8x64xf32>
    %353 = arith.select %350, %352, %348 : vector<8x64xi1>, vector<8x64xf32>
    %cst_182 = arith.constant 1.000000e+00 : f32
    %354 = vector.broadcast %cst_182 : f32 to vector<8x64xf32>
    %355 = arith.addf %354, %353 : vector<8x64xf32>
    %356 = arith.mulf %318, %355 : vector<8x64xf32>
    %c1_183 = arith.constant 1 : index
    %c0_184 = arith.constant 0 : index
    %c0_185 = arith.constant 0 : index
    %357 = vector.load %arg12[%c1_183, %c0_184, %c0_185] : memref<2x64x32xf32, #tpu.memory_space<vmem>>, vector<1x64x32xf32>
    %358 = vector.shape_cast %357 : vector<1x64x32xf32> to vector<64x32xf32>
    %cst_186 = arith.constant dense<0.000000e+00> : vector<8x32xf32>
    %359 = tpu.matmul %356, %358, %cst_186 {dimension_numbers = #tpu.dot_dimension_numbers<[1], [0], [0], [1], [0, 0, 1, 1], [], []>} : vector<8x64xf32>, vector<64x32xf32>, vector<8x32xf32> -> vector<8x32xf32>
    %c1_187 = arith.constant 1 : index
    %c0_188 = arith.constant 0 : index
    %c0_189 = arith.constant 0 : index
    %360 = vector.load %arg13[%c1_187, %c0_188, %c0_189] : memref<2x1x32xf32, #tpu.memory_space<vmem>>, vector<1x1x32xf32>
    %361 = vector.shape_cast %360 : vector<1x1x32xf32> to vector<1x32xf32>
    %362 = vector.broadcast %361 : vector<1x32xf32> to vector<8x32xf32>
    %363 = arith.addf %359, %362 : vector<8x32xf32>
    %364 = arith.addf %309, %363 : vector<8x32xf32>
    %c1_190 = arith.constant 1 : index
    %c0_191 = arith.constant 0 : index
    %c0_192 = arith.constant 0 : index
    %365 = vector.load %arg14[%c1_190, %c0_191, %c0_192] : memref<2x1x32xf32, #tpu.memory_space<vmem>>, vector<1x1x32xf32>
    %366 = vector.shape_cast %365 : vector<1x1x32xf32> to vector<1x32xf32>
    %c1_193 = arith.constant 1 : index
    %c0_194 = arith.constant 0 : index
    %c0_195 = arith.constant 0 : index
    %367 = vector.load %arg15[%c1_193, %c0_194, %c0_195] : memref<2x1x32xf32, #tpu.memory_space<vmem>>, vector<1x1x32xf32>
    %368 = vector.shape_cast %367 : vector<1x1x32xf32> to vector<1x32xf32>
    %cst_196 = arith.constant dense<0.000000e+00> : vector<8xf32>
    %369 = vector.multi_reduction <add>, %364, %cst_196 [1] : vector<8x32xf32> to vector<8xf32>
    %370 = vector.shape_cast %369 : vector<8xf32> to vector<8x1xf32>
    %cst_197 = arith.constant 3.200000e+01 : f32
    %371 = vector.broadcast %cst_197 : f32 to vector<8x1xf32>
    %372 = arith.divf %370, %371 : vector<8x1xf32>
    %373 = vector.broadcast %372 : vector<8x1xf32> to vector<8x32xf32>
    %374 = arith.subf %364, %373 : vector<8x32xf32>
    %375 = arith.mulf %374, %374 : vector<8x32xf32>
    %cst_198 = arith.constant dense<0.000000e+00> : vector<8xf32>
    %376 = vector.multi_reduction <add>, %375, %cst_198 [1] : vector<8x32xf32> to vector<8xf32>
    %377 = vector.shape_cast %376 : vector<8xf32> to vector<8x1xf32>
    %cst_199 = arith.constant 3.200000e+01 : f32
    %378 = vector.broadcast %cst_199 : f32 to vector<8x1xf32>
    %379 = arith.divf %377, %378 : vector<8x1xf32>
    %380 = vector.broadcast %372 : vector<8x1xf32> to vector<8x32xf32>
    %381 = arith.subf %364, %380 : vector<8x32xf32>
    %cst_200 = arith.constant 9.99999996E-13 : f32
    %382 = vector.broadcast %cst_200 : f32 to vector<8x1xf32>
    %383 = arith.addf %379, %382 : vector<8x1xf32>
    %384 = math.rsqrt %383 : vector<8x1xf32>
    %385 = vector.broadcast %384 : vector<8x1xf32> to vector<8x32xf32>
    %386 = arith.mulf %381, %385 : vector<8x32xf32>
    %387 = vector.broadcast %366 : vector<1x32xf32> to vector<8x32xf32>
    %388 = arith.mulf %386, %387 : vector<8x32xf32>
    %389 = vector.broadcast %368 : vector<1x32xf32> to vector<8x32xf32>
    %390 = arith.addf %388, %389 : vector<8x32xf32>
    %c0_201 = arith.constant 0 : index
    %c0_202 = arith.constant 0 : index
    %c0_203 = arith.constant 0 : index
    %391 = vector.load %arg18[%c0_201, %c0_202, %c0_203] : memref<1x8x32xf32, #tpu.memory_space<vmem>>, vector<1x8x32xf32>
    %392 = vector.shape_cast %391 : vector<1x8x32xf32> to vector<8x32xf32>
    %393 = vector.shape_cast %390 : vector<8x32xf32> to vector<1x8x32xf32>
    tpu.vector_store %arg18[%c0_201, %c0_202, %c0_203], %393 {strides = array<i32>} : memref<1x8x32xf32, #tpu.memory_space<vmem>>, vector<1x8x32xf32>,
    %c0_204 = arith.constant 0 : index
    %c0_205 = arith.constant 0 : index
    %394 = vector.load %arg16[%c0_204, %c0_205] : memref<32x128xf32, #tpu.memory_space<vmem>>, vector<32x128xf32>
    %cst_206 = arith.constant dense<0.000000e+00> : vector<8x128xf32>
    %395 = tpu.matmul %390, %394, %cst_206 {dimension_numbers = #tpu.dot_dimension_numbers<[1], [0], [0], [1], [0, 0, 1, 1], [], []>} : vector<8x32xf32>, vector<32x128xf32>, vector<8x128xf32> -> vector<8x128xf32>
    %c0_207 = arith.constant 0 : index
    %c0_208 = arith.constant 0 : index
    %396 = vector.load %arg17[%c0_207, %c0_208] : memref<1x128xf32, #tpu.memory_space<vmem>>, vector<1x128xf32>
    %397 = vector.broadcast %396 : vector<1x128xf32> to vector<8x128xf32>
    %398 = arith.addf %395, %397 : vector<8x128xf32>
    %c0_209 = arith.constant 0 : index
    %c0_210 = arith.constant 0 : index
    %c0_211 = arith.constant 0 : index
    %399 = vector.load %arg19[%c0_209, %c0_210, %c0_211] : memref<1x8x128xf32, #tpu.memory_space<vmem>>, vector<1x8x128xf32>
    %400 = vector.shape_cast %399 : vector<1x8x128xf32> to vector<8x128xf32>
    %401 = vector.shape_cast %398 : vector<8x128xf32> to vector<1x8x128xf32>
    tpu.vector_store %arg19[%c0_209, %c0_210, %c0_211], %401 {strides = array<i32>} : memref<1x8x128xf32, #tpu.memory_space<vmem>>, vector<1x8x128xf32>,
    return
  }
  func.func @transform_0(%arg0: i32) -> (i32, i32, i32) {
    %c0_i32 = arith.constant 0 : i32
    %c0_i32_0 = arith.constant 0 : i32
    %c0_i32_1 = arith.constant 0 : i32
    return %arg0, %c0_i32, %c0_i32_0 : i32, i32, i32
  }
  func.func @transform_1(%arg0: i32) -> (i32, i32) {
    %c0_i32 = arith.constant 0 : i32
    %c0_i32_0 = arith.constant 0 : i32
    %c0_i32_1 = arith.constant 0 : i32
    return %c0_i32, %c0_i32_0 : i32, i32
  }
  func.func @transform_2(%arg0: i32) -> (i32, i32) {
    %c0_i32 = arith.constant 0 : i32
    %c0_i32_0 = arith.constant 0 : i32
    %c0_i32_1 = arith.constant 0 : i32
    return %c0_i32, %c0_i32_0 : i32, i32
  }
  func.func @transform_3(%arg0: i32) -> (i32, i32, i32, i32) {
    %c0_i32 = arith.constant 0 : i32
    %c0_i32_0 = arith.constant 0 : i32
    %c0_i32_1 = arith.constant 0 : i32
    %c0_i32_2 = arith.constant 0 : i32
    %c0_i32_3 = arith.constant 0 : i32
    return %c0_i32, %c0_i32_0, %c0_i32_1, %c0_i32_2 : i32, i32, i32, i32
  }
  func.func @transform_4(%arg0: i32) -> (i32, i32, i32, i32) {
    %c0_i32 = arith.constant 0 : i32
    %c0_i32_0 = arith.constant 0 : i32
    %c0_i32_1 = arith.constant 0 : i32
    %c0_i32_2 = arith.constant 0 : i32
    %c0_i32_3 = arith.constant 0 : i32
    return %c0_i32, %c0_i32_0, %c0_i32_1, %c0_i32_2 : i32, i32, i32, i32
  }
  func.func @transform_5(%arg0: i32) -> (i32, i32, i32) {
    %c0_i32 = arith.constant 0 : i32
    %c0_i32_0 = arith.constant 0 : i32
    %c0_i32_1 = arith.constant 0 : i32
    %c0_i32_2 = arith.constant 0 : i32
    return %c0_i32, %c0_i32_0, %c0_i32_1 : i32, i32, i32
  }
  func.func @transform_6(%arg0: i32) -> (i32, i32, i32) {
    %c0_i32 = arith.constant 0 : i32
    %c0_i32_0 = arith.constant 0 : i32
    %c0_i32_1 = arith.constant 0 : i32
    %c0_i32_2 = arith.constant 0 : i32
    return %c0_i32, %c0_i32_0, %c0_i32_1 : i32, i32, i32
  }
  func.func @transform_7(%arg0: i32) -> (i32, i32, i32) {
    %c0_i32 = arith.constant 0 : i32
    %c0_i32_0 = arith.constant 0 : i32
    %c0_i32_1 = arith.constant 0 : i32
    %c0_i32_2 = arith.constant 0 : i32
    return %c0_i32, %c0_i32_0, %c0_i32_1 : i32, i32, i32
  }
  func.func @transform_8(%arg0: i32) -> (i32, i32, i32) {
    %c0_i32 = arith.constant 0 : i32
    %c0_i32_0 = arith.constant 0 : i32
    %c0_i32_1 = arith.constant 0 : i32
    %c0_i32_2 = arith.constant 0 : i32
    return %c0_i32, %c0_i32_0, %c0_i32_1 : i32, i32, i32
  }
  func.func @transform_9(%arg0: i32) -> (i32, i32, i32) {
    %c0_i32 = arith.constant 0 : i32
    %c0_i32_0 = arith.constant 0 : i32
    %c0_i32_1 = arith.constant 0 : i32
    %c0_i32_2 = arith.constant 0 : i32
    return %c0_i32, %c0_i32_0, %c0_i32_1 : i32, i32, i32
  }
  func.func @transform_10(%arg0: i32) -> (i32, i32, i32) {
    %c0_i32 = arith.constant 0 : i32
    %c0_i32_0 = arith.constant 0 : i32
    %c0_i32_1 = arith.constant 0 : i32
    %c0_i32_2 = arith.constant 0 : i32
    return %c0_i32, %c0_i32_0, %c0_i32_1 : i32, i32, i32
  }
  func.func @transform_11(%arg0: i32) -> (i32, i32, i32) {
    %c0_i32 = arith.constant 0 : i32
    %c0_i32_0 = arith.constant 0 : i32
    %c0_i32_1 = arith.constant 0 : i32
    %c0_i32_2 = arith.constant 0 : i32
    return %c0_i32, %c0_i32_0, %c0_i32_1 : i32, i32, i32
  }
  func.func @transform_12(%arg0: i32) -> (i32, i32, i32) {
    %c0_i32 = arith.constant 0 : i32
    %c0_i32_0 = arith.constant 0 : i32
    %c0_i32_1 = arith.constant 0 : i32
    %c0_i32_2 = arith.constant 0 : i32
    return %c0_i32, %c0_i32_0, %c0_i32_1 : i32, i32, i32
  }
  func.func @transform_13(%arg0: i32) -> (i32, i32, i32) {
    %c0_i32 = arith.constant 0 : i32
    %c0_i32_0 = arith.constant 0 : i32
    %c0_i32_1 = arith.constant 0 : i32
    %c0_i32_2 = arith.constant 0 : i32
    return %c0_i32, %c0_i32_0, %c0_i32_1 : i32, i32, i32
  }
  func.func @transform_14(%arg0: i32) -> (i32, i32, i32) {
    %c0_i32 = arith.constant 0 : i32
    %c0_i32_0 = arith.constant 0 : i32
    %c0_i32_1 = arith.constant 0 : i32
    %c0_i32_2 = arith.constant 0 : i32
    return %c0_i32, %c0_i32_0, %c0_i32_1 : i32, i32, i32
  }
  func.func @transform_15(%arg0: i32) -> (i32, i32) {
    %c0_i32 = arith.constant 0 : i32
    %c0_i32_0 = arith.constant 0 : i32
    %c0_i32_1 = arith.constant 0 : i32
    return %c0_i32, %c0_i32_0 : i32, i32
  }
  func.func @transform_16(%arg0: i32) -> (i32, i32) {
    %c0_i32 = arith.constant 0 : i32
    %c0_i32_0 = arith.constant 0 : i32
    %c0_i32_1 = arith.constant 0 : i32
    return %c0_i32, %c0_i32_0 : i32, i32
  }
  func.func @transform_17(%arg0: i32) -> (i32, i32, i32) {
    %c0_i32 = arith.constant 0 : i32
    %c0_i32_0 = arith.constant 0 : i32
    %c0_i32_1 = arith.constant 0 : i32
    return %arg0, %c0_i32, %c0_i32_0 : i32, i32, i32
  }
  func.func @transform_18(%arg0: i32) -> (i32, i32, i32) {
    %c0_i32 = arith.constant 0 : i32
    %c0_i32_0 = arith.constant 0 : i32
    %c0_i32_1 = arith.constant 0 : i32
    return %arg0, %c0_i32, %c0_i32_0 : i32, i32, i32
  }
}

</mosaic_0001>

<bundles_post_ra>
// kernel: fwd.1
= control target key start
LH: loop header
LB: loop body
LE: loop exit
PB: predicated region body
PF: predicated region fallthrough
CT: control target
= control target key end

     0   :  { %s3191_s27 = smov 0   ;;  %s3653_s0 = inlined_call_operand.vmem [shape: f32[2,8,32], index: 0, kind: input, shape index: {}]   ;;  %s3654_s1 = inlined_call_operand.vmem [shape: f32[1,32], index: 1, kind: input, shape index: {}]   ;;  %s3655_s2 = inlined_call_operand.vmem [shape: f32[1,32], index: 2, kind: input, shape index: {}]   ;;  %s3656_s3 = inlined_call_operand.vmem [shape: f32[2,3,32,32], index: 3, kind: input, shape index: {}]   ;;  %s3657_s4 = inlined_call_operand.vmem [shape: f32[2,3,1,32], index: 4, kind: input, shape index: {}]   ;;  %s3658_s5 = inlined_call_operand.vmem [shape: f32[2,32,32], index: 5, kind: input, shape index: {}]   ;;  %s3659_s6 = inlined_call_operand.vmem [shape: f32[2,1,32], index: 6, kind: input, shape index: {}]   ;;  %s3660_s7 = inlined_call_operand.vmem [shape: f32[2,1,32], index: 7, kind: input, shape index: {}]   ;;  %s3661_s8 = inlined_call_operand.vmem [shape: f32[2,1,32], index: 8, kind: input, shape index: {}]   ;;  %s3662_s9 = inlined_call_operand.vmem [shape: f32[2,32,64], index: 9, kind: input, shape index: {}]   ;;  %s3663_s10 = inlined_call_operand.vmem [shape: f32[2,1,64], index: 10, kind: input, shape index: {}]   ;;  %s3664_s11 = inlined_call_operand.vmem [shape: f32[2,64,32], index: 11, kind: input, shape index: {}]   ;;  %s3665_s12 = inlined_call_operand.vmem [shape: f32[2,1,32], index: 12, kind: input, shape index: {}]   ;;  %s3666_s13 = inlined_call_operand.vmem [shape: f32[2,1,32], index: 13, kind: input, shape index: {}]   ;;  %s3667_s14 = inlined_call_operand.vmem [shape: f32[2,1,32], index: 14, kind: input, shape index: {}]   ;;  %s3668_s15 = inlined_call_operand.vmem [shape: f32[32,128], index: 15, kind: input, shape index: {}]   ;;  %s3669_s16 = inlined_call_operand.vmem [shape: f32[1,128], index: 16, kind: input, shape index: {}]   ;;  %s3670_s17 = inlined_call_operand.vmem [shape: f32[2,8,32], index: 17, kind: output, shape index: {0}]   ;;  %s3671_s18 = inlined_call_operand.vmem [shape: f32[2,8,128], index: 18, kind: output, shape index: {1}]  }
   0x1   :  { %3672 = sst [smem:[#allocation2_spill]] %s3653_s0 }
   0x2   :  { %3673 = sst [smem:[#allocation3_spill]] %s3654_s1 }
   0x3   :  { %3674 = sst [smem:[#allocation4_spill]] %s3655_s2 }
   0x4 LB: > { %s2642_s28 = sadd.s32 4294967295, %s3092_s27   ;;  %p2646_p0 = scmp.ge.s32.totalorder %s3092_s27, 1  ;;  %s3092_s27 = sphi %s3191_s27, %s29_s27  }
   0x5   : > { %p514_p1 = scmp.lt.s32.totalorder %s3092_s27, 3 }
   0x7   : > { %p515_p2 = pnand %p2646_p0, %p514_p1 }
   0x8   : > { %p570_p3 = scmp.lt.s32.totalorder (!%p515_p2), %s2642_s28, 1  ;;  %s3675_s19 = sld [smem:[#allocation2_spill]] (!%p515_p2) }
   0x9   : > { %518 = sbr.rel (%p515_p2) target bundleno = 4854 (0x12f6), region = 88  ;;  %s3676_s24 = sld [smem:[#allocation3_spill]] (!%p515_p2) }
   0xe   : > { %s3679_s28 = smov (!%p570_p3, %s2642_s28), 1  ;;  %vm585_vm0 = vcmask 261120   ;;  %v629_v7 = vld [vmem:[%s3656_s3 + $0x18] sm:$0xff]  ;;  %v3094_v9 = vmov 0.0   ;;  %v628_v10 = vld [vmem:[%s3656_s3 + $0x10] sm:$0xff]  ;;  %v627_v12 = vld [vmem:[%s3656_s3 + $0x8] sm:$0xff]  ;;  %v614_v29 = vlaneseq }
   0xf   : > { %s3199_s29 = sshll.u32 %s3679_s28, 3  ;;  %v2659_v8 = vld [vmem:[%s3656_s3 + $0x38] sm:$0xff]  ;;  %2843 = vmatprep.subr.mxu0 %v3094_v9  ;;  %2854 = vmatprep.subr.mxu1 %v3094_v9  ;;  %v2658_v11 = vld [vmem:[%s3656_s3 + $0x30] sm:$0xff]  ;;  %v2657_v13 = vld [vmem:[%s3656_s3 + $0x28] sm:$0xff]  ;;  %vm3095_vm1 = vmmov 0   ;;  %s3677_s28 = sld [smem:[#allocation4_spill]] }
  0x10   : > { %s573_s1 = scalar_lea.vmem %s3675_s19, %s3199_s29  ;;  %2844 = vmatpush3.msra.mxu0 %v629_v7  ;;  %2855 = vmatpush3.msra.mxu1 %v2659_v8  ;;  %v626_v14 = vld [vmem:[%s3656_s3] sm:$0xff]  ;;  %v2666_v25 = vld [vmem:[%s3656_s3 + $0x58] sm:$0xff]  ;;  %v2665_v26 = vld [vmem:[%s3656_s3 + $0x50] sm:$0xff]  ;;  %v615_v30 = vand.u32 127, %v614_v29  ;;  %vm954_vm6 = vcmask 64512   ;;  %vm1440_vm8 = vcmask 523264   ;;  %s581_s23 = scalar_lea.vmem %s3671_s18, %s3199_s29 }
  0x11   : > { %v582_v0 = vld [vmem:[%s573_s1] sm:$0xff]  ;;  %2845 = vmatprep.subr.mxu0 %v3094_v9  ;;  %2856 = vmatprep.subr.mxu1 %v3094_v9  ;;  %v2664_v27 = vld [vmem:[%s3656_s3 + $0x48] sm:$0xff]  ;;  %s577_s1 = scalar_lea.vmem %s3670_s17, %s3199_s29 }
  0x12   : > { %v586_v1 = vsel %vm585_vm0, %v582_v0, 0.0  ;;  %2846 = vmatpush3.msra.mxu0 %v628_v10  ;;  %2857 = vmatpush3.msra.mxu1 %v2658_v11  ;;  %v2656_v15 = vld [vmem:[%s3656_s3 + $0x20] sm:$0xff]  ;;  %vm617_vm2 = vcmp.lt.s32.totalorder %v615_v30, 16  ;;  %vm621_vm3 = vcmp.ge.s32.totalorder %v615_v30, 16  ;;  %vm622_vm4 = vcmp.lt.s32.totalorder %v615_v30, 32  ;;  %v1203_v10 = vld [vmem:[%s3658_s5 + $0x18] sm:$0xff] }
  0x13   : > { %587 = vadd.xlane.f32.xlu0 %v586_v1  ;;  %2847 = vmatprep.subr.mxu0 %v3094_v9  ;;  %v2650_v20 = vld [vmem:[%s3676_s24] ss:$0 sm:$0xff]  ;;  %v2661_v32 = vld [vmem:[%s3657_s4 + $0x1] ss:$0 sm:$0xff]  ;;  %v3288_v33 = vsel %vm617_vm2, 1.0, %v3094_v9  ;;  %vm623_vm5 = vmand %vm621_vm3, %vm622_vm4 }
  0x14   : > { %2858 = vmatprep.subr.mxu1 %v3094_v9  ;;  %2848 = vmatpush3.msra.mxu0 %v627_v12  ;;  %v2663_v28 = vld [vmem:[%s3656_s3 + $0x40] sm:$0xff]  ;;  %v3294_v41 = vsel %vm623_vm5, 1.0, %v3094_v9  ;;  %v1202_v11 = vld [vmem:[%s3658_s5 + $0x10] sm:$0xff]  ;;  %v1201_v12 = vld [vmem:[%s3658_s5 + $0x8] sm:$0xff] }
  0x15   : > { %2859 = vmatpush3.msra.mxu1 %v2657_v13  ;;  %2849 = vmatprep.subr.mxu0 %v3094_v9  ;;  %v2651_v22 = vld [vmem:[%s3677_s28] ss:$0 sm:$0xff]  ;;  %v2668_v42 = vld [vmem:[%s3657_s4 + $0x2] ss:$0 sm:$0xff] }
  0x16   : > { %2860 = vmatprep.subr.mxu1 %v3094_v9  ;;  %2850 = vmatpush3.msra.mxu0 %v626_v14  ;;  %v2654_v31 = vld [vmem:[%s3657_s4] ss:$0 sm:$0xff] }
  0x17   : > { %2851 = vmatprep.mubr.msk.f32.mxu0 %vm3095_vm1, %v3094_v9  ;;  %2861 = vmatpush3.msra.mxu1 %v2656_v15  ;;  %v1200_v13 = vld [vmem:[%s3658_s5] sm:$0xff] }
  0x18   : > { %2862 = vmatprep.mubr.msk.f32.mxu1 %vm3095_vm1, %v3094_v9  ;;  %2865 = vmatprep.subr.mxu0 %v3094_v9 }
  0x19   : > { %2876 = vmatprep.subr.mxu1 %v3094_v9 }
  0x9c   : > { %v588_v2 = vpop.xlane.xlu0 %587 }
  0x9d   : > { %v590_v3 = vmul.f32 0.03125, %v588_v2 }
  0x9f   : > { %v591_v4 = vsub.f32 %v582_v0, %v590_v3 }
  0xa1   : > { %v592_v5 = vmul.f32 %v591_v4, %v591_v4 }
  0xa3   : > { %v593_v6 = vsel %vm585_vm0, %v592_v5, 0.0 }
  0xa4   : > { %594 = vadd.xlane.f32.xlu0 %v593_v6 }
 0x12d   : > { %v595_v16 = vpop.xlane.xlu0 %594 }
 0x12e   : > { %v596_v17 = vmul.f32 0.03125, %v595_v16 }
 0x130   : > { %v597_v18 = vadd.f32 1e-12, %v596_v17 }
 0x132   : > { %3052 = vrsqrt.f32 %v597_v18 }
 0x13f   : > { %v3053_v19 = vpop.eup %3052 }
 0x140   : > { %v599_v21 = vmul.f32 %v3053_v19, %v591_v4  ;;  %v2676_v19 = vld [vmem:[%s3659_s6] ss:$0 sm:$0xff] }
 0x142   : > { %v606_v23 = vmul.f32 %v2650_v20, %v599_v21 }
 0x144   : > { %v3251_v24 = vadd.f32 %v2651_v22, %v606_v23 }
 0x146   : > { %2852 = vmatmul.mubr.msk.f32.vlgmr.msra.gmra.mxu0 %vm585_vm0, %v3251_v24  ;;  %2863 = vmatmul.mubr.msk.f32.vlgmr.msra.gmra.mxu1 %vm585_vm0, %v3251_v24 }
 0x147   : > { %2866 = vmatpush3.msra.mxu0 %v2666_v25  ;;  %2873 = vmatprep.mubr.msk.f32.mxu0 %vm3095_vm1, %v3094_v9 }
 0x148   : > { %2867 = vmatprep.subr.mxu0 %v3094_v9  ;;  %2878 = vmatprep.mubr.msk.f32.mxu1 %vm3095_vm1, %v3094_v9 }
 0x149   : > { %2868 = vmatpush3.msra.mxu0 %v2665_v26 }
 0x14a   : > { %2869 = vmatprep.subr.mxu0 %v3094_v9 }
 0x14b   : > { %2870 = vmatpush3.msra.mxu0 %v2664_v27 }
 0x14c   : > { %2871 = vmatprep.subr.mxu0 %v3094_v9 }
 0x14d   : > { %2872 = vmatpush3.msra.mxu0 %v2663_v28 }
 0x14e   : > { %2874 = vmatmul.mubr.msk.f32.vlgmr.msra.gmra.mxu0 %vm585_vm0, %v3251_v24  ;;  %2896 = vmatprep.subr.mxu0 %v3094_v9 }
 0x14f   : > { %2904 = vmatprep.mubr.msk.f32.mxu0 %vm3095_vm1, %v3094_v9  ;;  %2897 = vmatpush3.msra.mxu0 %v1203_v10 }
 0x150   : > { %2898 = vmatprep.subr.mxu0 %v3094_v9 }
 0x151   : > { %2899 = vmatpush3.msra.mxu0 %v1202_v11 }
 0x152   : > { %2900 = vmatprep.subr.mxu0 %v3094_v9 }
 0x153   : > { %2901 = vmatpush3.msra.mxu0 %v1201_v12 }
 0x154   : > { %2902 = vmatprep.subr.mxu0 %v3094_v9 }
 0x155   : > { %2903 = vmatpush3.msra.mxu0 %v1200_v13 }
 0x156   : > { %2918 = vmatprep.subr.mxu0 %v3094_v9 }
 0x206   : > { %v706_v34 = vpop.f32.mrf.mxu0  ;;  %v789_v35 = vpop.f32.mrf.mxu1 }
 0x207   : > { %v707_v36 = vadd.f32 %v2654_v31, %v706_v34  ;;  %v790_v37 = vadd.f32 %v2661_v32, %v789_v35  ;;  %v1317_v31 = vld [vmem:[%s3662_s9 + $0x18] sm:$0xff]  ;;  %v1316_v32 = vld [vmem:[%s3662_s9 + $0x10] sm:$0xff]  ;;  %v1314_v34 = vld [vmem:[%s3662_s9] sm:$0xff] }
 0x208   : > { %v2853_v38 = vpop.f32.mrf.mxu0  ;;  %v2864_v39 = vpop.f32.mrf.mxu1 }
 0x209   : > { %v876_v40 = vmul.f32 %v3288_v33, %v707_v36  ;;  %2877 = vmatpush3.xpose.msk.msra.mxu1 %vm585_vm0, %v790_v37  ;;  %v967_v43 = vmul.f32 %v3294_v41, %v707_v36  ;;  %v2678_v39 = vld [vmem:[%s3660_s7] ss:$0 sm:$0xff] }
 0x20a   : > { %2881 = vmatprep.subr.mxu1 %v3094_v9 }
 0x20c   : > { %2879 = vmatmul.mubr.msk.f32.vlgmr.msra.gmra.mxu1 %vm585_vm0, %v876_v40 }
 0x20d   : > { %2882 = vmatpush3.xpose.msk.msra.mxu1 %vm585_vm0, %v790_v37  ;;  %2883 = vmatprep.mubr.msk.f32.mxu1 %vm3095_vm1, %v3094_v9 }
 0x20e   : > { %v872_v44 = vpop.f32.mrf.mxu0  ;;  %2886 = vmatprep.subr.mxu1 %v3094_v9 }
 0x20f   : > { %v873_v45 = vadd.f32 %v2668_v42, %v872_v44  ;;  %v2679_v42 = vld [vmem:[%s3661_s8] ss:$0 sm:$0xff] }
 0x210   : > { %v2875_v46 = vpop.f32.mrf.mxu0  ;;  %2884 = vmatmul.mubr.msk.f32.vlgmr.msra.gmra.mxu1 %vm585_vm0, %v967_v43 }
 0x211   : > { %v1053_v47 = vmul.f32 %v3294_v41, %v873_v45  ;;  %2888 = vmatprep.mubr.msk.f32.mxu1 %vm3095_vm1, %v3094_v9  ;;  %v966_v6 = vmul.f32 %v3288_v33, %v873_v45  ;;  %v1432_v45 = vld [vmem:[%s3664_s11 + $0x38] sm:$0xff]  ;;  %v1431_v46 = vld [vmem:[%s3664_s11 + $0x30] sm:$0xff] }
 0x213   : > { %2887 = vmatpush3.msra.mxu1 %v1053_v47  ;;  %v1430_v47 = vld [vmem:[%s3664_s11 + $0x28] sm:$0xff] }
 0x214   : > { %2891 = vmatprep.subr.mxu1 %v3094_v9 }
 0x2cc   : > { %v949_v48 = vpop.f32.mrf.mxu1 }
 0x2cd   : > { %v953_v53 = vmul.f32 0.25, %v949_v48  ;;  %v1429_v48 = vld [vmem:[%s3664_s11 + $0x20] sm:$0xff] }
 0x2ce   : > { %v2880_v49 = vpop.f32.mrf.mxu1 }
 0x2cf   : > { %v955_v55 = vsel %vm954_vm6, %v953_v53, -inf  ;;  %v1428_v49 = vld [vmem:[%s3664_s11 + $0x18] sm:$0xff] }
 0x2d0   : > { %v1037_v50 = vpop.f32.mrf.mxu1 }
 0x2d1   : > { %v1041_v51 = vmul.f32 0.25, %v1037_v50  ;;  %v1427_v50 = vld [vmem:[%s3664_s11 + $0x10] sm:$0xff] }
 0x2d2   : > { %v2885_v52 = vpop.f32.mrf.mxu1 }
 0x2d3   : > { %v1042_v54 = vsel %vm954_vm6, %v1041_v51, -inf  ;;  %v1425_v52 = vld [vmem:[%s3664_s11] sm:$0xff] }
 0x2d4   : > { %1043 = vmax.xlane.f32.xlu1 %v1042_v54 }
 0x2d8   : > { %956 = vmax.xlane.f32.xlu1 %v955_v55 }
 0x35d   : > { %v1044_v56 = vpop.xlane.xlu1 %1043 }
 0x35e   : > { %v1045_v57 = vsub.f32 %v1041_v51, %v1044_v56  ;;  %v1426_v51 = vld [vmem:[%s3664_s11 + $0x8] sm:$0xff] }
 0x360   : > { %v1046_v58 = vmul.f32 1.442695, %v1045_v57 }
 0x361   : > { %v957_v59 = vpop.xlane.xlu1 %956 }
 0x362   : > { %3054 = vpow2.f32 %v1046_v58  ;;  %v958_v60 = vsub.f32 %v953_v53, %v957_v59  ;;  %v2680_v53 = vld [vmem:[%s3663_s10] ss:$0 sm:$0xff] }
 0x364   : > { %v959_v61 = vmul.f32 1.442695, %v958_v60 }
 0x366   : > { %3056 = vpow2.f32 %v959_v61 }
 0x36f   : > { %v3055_v62 = vpop.eup %3054 }
 0x370   : > { %v1048_v63 = vsel %vm954_vm6, %v3055_v62, 0.0 }
 0x371   : > { %1049 = vadd.xlane.f32.xlu0 %v1048_v63 }
 0x373   : > { %v3057_v0 = vpop.eup %3056 }
 0x374   : > { %v961_v1 = vsel %vm954_vm6, %v3057_v0, 0.0 }
 0x375   : > { %962 = vadd.xlane.f32.xlu1 %v961_v1 }
 0x3fa   : > { %v1050_v2 = vpop.xlane.xlu0 %1049 }
 0x3fb   : > { %3058 = vrcp.f32 %v1050_v2 }
 0x3fe   : > { %v963_v3 = vpop.xlane.xlu1 %962 }
 0x3ff   : > { %3060 = vrcp.f32 %v963_v3 }
 0x408   : > { %v3059_v4 = vpop.eup %3058 }
 0x409   : > { %v1052_v5 = vmul.f32 %v3059_v4, %v3055_v62 }
 0x40b   : > { %2889 = vmatmul.mubr.msk.f32.vlgmr.msra.gmra.mxu1 %vm954_vm6, %v1052_v5 }
 0x40c   : > { %v3061_v7 = vpop.eup %3060  ;;  %2892 = vmatpush3.msra.mxu1 %v966_v6  ;;  %2893 = vmatprep.mubr.msk.f32.mxu1 %vm3095_vm1, %v3094_v9 }
 0x40d   : > { %v965_v8 = vmul.f32 %v3061_v7, %v3057_v0  ;;  %2907 = vmatprep.subr.mxu1 %v3094_v9 }
 0x40f   : > { %2894 = vmatmul.mubr.msk.f32.vlgmr.msra.gmra.mxu1 %vm954_vm6, %v965_v8 }
 0x410   : > { %2915 = vmatprep.mubr.msk.f32.mxu1 %vm3095_vm1, %v3094_v9  ;;  %2908 = vmatpush3.msra.mxu1 %v1317_v31  ;;  %v2691_v31 = vld [vmem:[%s3656_s3 + $0x78] sm:$0xff] }
 0x411   : > { %2909 = vmatprep.subr.mxu1 %v3094_v9 }
 0x412   : > { %2910 = vmatpush3.msra.mxu1 %v1316_v32  ;;  %v2705_v32 = vld [vmem:[%s3656_s3 + $0xb8] sm:$0xff] }
 0x413   : > { %2911 = vmatprep.subr.mxu1 %v3094_v9 }
 0x4cb   : > { %v1123_v14 = vpop.f32.mrf.mxu1 }
 0x4cd   : > { %v2890_v15 = vpop.f32.mrf.mxu1 }
 0x4cf   : > { %v1196_v16 = vpop.f32.mrf.mxu1 }
 0x4d0   : > { %v1197_v17 = vadd.f32 %v1196_v16, %v1123_v14 }
 0x4d1   : > { %v2895_v18 = vpop.f32.mrf.mxu1 }
 0x4d2   : > { %2905 = vmatmul.mubr.msk.f32.vlgmr.msra.gmra.mxu0 %vm585_vm0, %v1197_v17 }
 0x4d3   : > { %2934 = vmatprep.mubr.msk.f32.mxu0 %vm3095_vm1, %v3094_v9  ;;  %2919 = vmatpush3.msra.mxu0 %v1432_v45 }
 0x4d4   : > { %2920 = vmatprep.subr.mxu0 %v3094_v9 }
 0x4d5   : > { %2921 = vmatpush3.msra.mxu0 %v1431_v46  ;;  %v2687_v46 = vld [vmem:[%s3667_s14] ss:$0 sm:$0xff] }
 0x4d6   : > { %2922 = vmatprep.subr.mxu0 %v3094_v9 }
 0x4d7   : > { %2923 = vmatpush3.msra.mxu0 %v1430_v47 }
 0x4d8   : > { %2924 = vmatprep.subr.mxu0 %v3094_v9 }
 0x4d9   : > { %2925 = vmatpush3.msra.mxu0 %v1429_v48 }
 0x4da   : > { %2926 = vmatprep.subr.mxu0 %v3094_v9 }
 0x4db   : > { %2927 = vmatpush3.msra.mxu0 %v1428_v49  ;;  %v2698_v49 = vld [vmem:[%s3656_s3 + $0x98] sm:$0xff] }
 0x4dc   : > { %2928 = vmatprep.subr.mxu0 %v3094_v9 }
 0x4dd   : > { %2929 = vmatpush3.msra.mxu0 %v1427_v50  ;;  %v2697_v50 = vld [vmem:[%s3656_s3 + $0x90] sm:$0xff] }
 0x4de   : > { %2930 = vmatprep.subr.mxu0 %v3094_v9 }
 0x4df   : > { %2931 = vmatpush3.msra.mxu0 %v1426_v51  ;;  %v2696_v51 = vld [vmem:[%s3656_s3 + $0x88] sm:$0xff] }
 0x4e0   : > { %2932 = vmatprep.subr.mxu0 %v3094_v9 }
 0x4e1   : > { %2933 = vmatpush3.msra.mxu0 %v1425_v52  ;;  %v2695_v52 = vld [vmem:[%s3656_s3 + $0x80] sm:$0xff] }
 0x4e2   : > { %2959 = vmatprep.subr.mxu0 %v3094_v9 }
 0x592   : > { %v1280_v20 = vpop.f32.mrf.mxu0 }
 0x593   : > { %v1281_v21 = vadd.f32 %v2676_v19, %v1280_v20  ;;  %v2684_v19 = vld [vmem:[%s3665_s12] ss:$0 sm:$0xff] }
 0x594   : > { %v2906_v22 = vpop.f32.mrf.mxu0 }
 0x595   : > { %v1284_v23 = vadd.f32 %v1281_v21, %v3251_v24  ;;  %v1315_v24 = vld [vmem:[%s3662_s9 + $0x8] sm:$0xff] }
 0x596   : > { %2912 = vmatpush3.msra.mxu1 %v1315_v24  ;;  %v2690_v24 = vld [vmem:[%s3656_s3 + $0x70] sm:$0xff] }
 0x597   : > { %v1287_v25 = vsel %vm585_vm0, %v1284_v23, 0.0  ;;  %2913 = vmatprep.subr.mxu1 %v3094_v9 }
 0x598   : > { %1288 = vadd.xlane.f32.xlu0 %v1287_v25  ;;  %2914 = vmatpush3.msra.mxu1 %v1314_v34  ;;  %v2704_v34 = vld [vmem:[%s3656_s3 + $0xb0] sm:$0xff] }
 0x599   : > { %2937 = vmatprep.subr.mxu1 %v3094_v9 }
 0x621   : > { %v1289_v26 = vpop.xlane.xlu0 %1288 }
 0x622   : > { %v1290_v27 = vmul.f32 0.03125, %v1289_v26 }
 0x624   : > { %v1291_v28 = vsub.f32 %v1284_v23, %v1290_v27 }
 0x626   : > { %v1292_v29 = vmul.f32 %v1291_v28, %v1291_v28 }
 0x628   : > { %v1293_v30 = vsel %vm585_vm0, %v1292_v29, 0.0 }
 0x629   : > { %1294 = vadd.xlane.f32.xlu1 %v1293_v30 }
 0x6b2   : > { %v1295_v35 = vpop.xlane.xlu1 %1294 }
 0x6b3   : > { %v1296_v36 = vmul.f32 0.03125, %v1295_v35  ;;  %v2689_v35 = vld [vmem:[%s3656_s3 + $0x68] sm:$0xff] }
 0x6b5   : > { %v1297_v37 = vadd.f32 1e-12, %v1296_v36  ;;  %v2703_v36 = vld [vmem:[%s3656_s3 + $0xa8] sm:$0xff] }
 0x6b7   : > { %3062 = vrsqrt.f32 %v1297_v37  ;;  %v2688_v37 = vld [vmem:[%s3656_s3 + $0x60] sm:$0xff] }
 0x6c4   : > { %v3063_v38 = vpop.eup %3062 }
 0x6c5   : > { %v1299_v40 = vmul.f32 %v3063_v38, %v1291_v28  ;;  %v2702_v38 = vld [vmem:[%s3656_s3 + $0xa0] sm:$0xff] }
 0x6c7   : > { %v1306_v43 = vmul.f32 %v2678_v39, %v1299_v40 }
 0x6c9   : > { %v3369_v44 = vadd.f32 %v2679_v42, %v1306_v43 }
 0x6cb   : > { %2916 = vmatmul.mubr.msk.f32.vlgmr.msra.gmra.mxu1 %vm585_vm0, %v3369_v44 }
 0x6cc   : > { %2945 = vmatprep.mubr.msk.f32.mxu1 %vm3095_vm1, %v3094_v9  ;;  %2938 = vmatpush3.msra.mxu1 %v2691_v31  ;;  %v2716_v31 = vld [vmem:[%s3658_s5 + $0x28] sm:$0xff] }
 0x6cd   : > { %2939 = vmatprep.subr.mxu1 %v3094_v9 }
 0x6ce   : > { %2940 = vmatpush3.msra.mxu1 %v2690_v24 }
 0x6cf   : > { %2941 = vmatprep.subr.mxu1 %v3094_v9 }
 0x6d0   : > { %2942 = vmatpush3.msra.mxu1 %v2689_v35 }
 0x6d1   : > { %2943 = vmatprep.subr.mxu1 %v3094_v9 }
 0x6d2   : > { %2944 = vmatpush3.msra.mxu1 %v2688_v37 }
 0x6d3   : > { %2948 = vmatprep.subr.mxu1 %v3094_v9 }
 0x78b   : > { %v1394_v54 = vpop.f32.mrf.mxu1 }
 0x78c   : > { %v1395_v55 = vadd.f32 %v2680_v53, %v1394_v54  ;;  %v2707_v53 = vld [vmem:[%s3657_s4 + $0x5] ss:$0 sm:$0xff] }
 0x78d   : > { %v2917_v56 = vpop.f32.mrf.mxu1 }
 0x78e   : > { %v1399_v57 = vmul.f32 0.70710677, %v1395_v55  ;;  %v1398_v16 = vmul.f32 0.5, %v1395_v55 }
 0x790   : > { %v1400_v58 = vand.u32 2147483647, %v1399_v57  ;;  %vm1420_vm7 = vcmp.lt.f32.partialorder %v1399_v57, 0.0 }
 0x792   : > { %v1401_v59 = vmul.f32 0.3275911, %v1400_v58  ;;  %v1414_v61 = vsub.f32 0.0, %v1400_v58 }
 0x794   : > { %v1402_v60 = vadd.f32 1.0, %v1401_v59  ;;  %v1415_v62 = vmul.f32 %v1414_v61, %v1400_v58  ;;  %v2700_v61 = vld [vmem:[%s3657_s4 + $0x4] ss:$0 sm:$0xff] }
 0x796   : > { %3064 = vrcp.f32 %v1402_v60  ;;  %v1416_v1 = vmul.f32 1.442695, %v1415_v62  ;;  %v2693_v60 = vld [vmem:[%s3657_s4 + $0x3] ss:$0 sm:$0xff] }
 0x798   : > { %3066 = vpow2.f32 %v1416_v1 }
 0x7a3   : > { %v3065_v63 = vpop.eup %3064 }
 0x7a4   : > { %v1405_v0 = vmul.f32 1.0614054, %v3065_v63 }
 0x7a5   : > { %v3067_v11 = vpop.eup %3066 }
 0x7a6   : > { %v2682_v2 = vadd.f32 -1.4531521, %v1405_v0 }
 0x7a8   : > { %v1407_v3 = vmul.f32 %v3065_v63, %v2682_v2 }
 0x7aa   : > { %v1408_v4 = vadd.f32 1.4214138, %v1407_v3 }
 0x7ac   : > { %v1409_v5 = vmul.f32 %v3065_v63, %v1408_v4 }
 0x7ae   : > { %v2683_v6 = vadd.f32 -0.28449672, %v1409_v5 }
 0x7b0   : > { %v1411_v7 = vmul.f32 %v3065_v63, %v2683_v6 }
 0x7b2   : > { %v1412_v8 = vadd.f32 0.2548296, %v1411_v7 }
 0x7b4   : > { %v1413_v10 = vmul.f32 %v3065_v63, %v1412_v8 }
 0x7b6   : > { %v1418_v12 = vmul.f32 %v3067_v11, %v1413_v10 }
 0x7b8   : > { %v1419_v13 = vsub.f32 1.0, %v1418_v12 }
 0x7ba   : > { %v1421_v14 = vsub.f32 0.0, %v1419_v13 }
 0x7bc   : > { %v1422_v15 = vsel %vm1420_vm7, %v1421_v14, %v1419_v13 }
 0x7bd   : > { %v1423_v17 = vadd.f32 1.0, %v1422_v15 }
 0x7bf   : > { %v1424_v18 = vmul.f32 %v1423_v17, %v1398_v16 }
 0x7c1   : > { %2935 = vmatmul.mubr.msk.f32.vlgmr.msra.gmra.mxu0 %vm1440_vm8, %v1424_v18 }
 0x7c2   : > { %2967 = vmatprep.mubr.msk.f32.mxu0 %vm3095_vm1, %v3094_v9  ;;  %2960 = vmatpush3.msra.mxu0 %v2705_v32  ;;  %v2715_v32 = vld [vmem:[%s3658_s5 + $0x20] sm:$0xff] }
 0x7c3   : > { %2961 = vmatprep.subr.mxu0 %v3094_v9 }
 0x7c4   : > { %2962 = vmatpush3.msra.mxu0 %v2704_v34 }
 0x7c5   : > { %2963 = vmatprep.subr.mxu0 %v3094_v9 }
 0x7c6   : > { %2964 = vmatpush3.msra.mxu0 %v2703_v36 }
 0x7c7   : > { %2965 = vmatprep.subr.mxu0 %v3094_v9 }
 0x7c8   : > { %2966 = vmatpush3.msra.mxu0 %v2702_v38  ;;  %v2720_v38 = vld [vmem:[%s3659_s6 + $0x1] ss:$0 sm:$0xff] }
 0x7c9   : > { %2980 = vmatprep.subr.mxu0 %v3094_v9 }
 0x881   : > { %v1510_v20 = vpop.f32.mrf.mxu0 }
 0x882   : > { %v1511_v21 = vadd.f32 %v2684_v19, %v1510_v20 }
 0x883   : > { %v2936_v22 = vpop.f32.mrf.mxu0 }
 0x884   : > { %v1514_v23 = vadd.f32 %v1511_v21, %v3369_v44  ;;  %v2686_v44 = vld [vmem:[%s3666_s13] ss:$0 sm:$0xff] }
 0x886   : > { %v1517_v25 = vsel %vm585_vm0, %v1514_v23, 0.0 }
 0x887   : > { %1518 = vadd.xlane.f32.xlu0 %v1517_v25 }
 0x910   : > { %v1519_v26 = vpop.xlane.xlu0 %1518 }
 0x911   : > { %v1520_v27 = vmul.f32 0.03125, %v1519_v26 }
 0x913   : > { %v1521_v28 = vsub.f32 %v1514_v23, %v1520_v27 }
 0x915   : > { %v1522_v29 = vmul.f32 %v1521_v28, %v1521_v28 }
 0x917   : > { %v1523_v30 = vsel %vm585_vm0, %v1522_v29, 0.0  ;;  %v2718_v29 = vld [vmem:[%s3658_s5 + $0x38] sm:$0xff] }
 0x918   : > { %1524 = vadd.xlane.f32.xlu1 %v1523_v30  ;;  %v2717_v30 = vld [vmem:[%s3658_s5 + $0x30] sm:$0xff] }
 0x9a1   : > { %v1525_v39 = vpop.xlane.xlu1 %1524 }
 0x9a2   : > { %v1526_v40 = vmul.f32 0.03125, %v1525_v39 }
 0x9a4   : > { %v1527_v42 = vadd.f32 1e-12, %v1526_v40 }
 0x9a6   : > { %3068 = vrsqrt.f32 %v1527_v42 }
 0x9b3   : > { %v3069_v43 = vpop.eup %3068 }
 0x9b4   : > { %v1529_v45 = vmul.f32 %v3069_v43, %v1521_v28 }
 0x9b6   : > { %v1536_v47 = vmul.f32 %v2686_v44, %v1529_v45 }
 0x9b8   : > { %v3457_v48 = vadd.f32 %v2687_v46, %v1536_v47 }
 0x9ba   : > { %2946 = vmatmul.mubr.msk.f32.vlgmr.msra.gmra.mxu1 %vm585_vm0, %v3457_v48  ;;  %2968 = vmatmul.mubr.msk.f32.vlgmr.msra.gmra.mxu0 %vm585_vm0, %v3457_v48 }
 0x9bb   : > { %2949 = vmatpush3.msra.mxu1 %v2698_v49  ;;  %2956 = vmatprep.mubr.msk.f32.mxu1 %vm3095_vm1, %v3094_v9 }
 0x9bc   : > { %2950 = vmatprep.subr.mxu1 %v3094_v9  ;;  %2982 = vmatprep.mubr.msk.f32.mxu0 %vm3095_vm1, %v3094_v9 }
 0x9bd   : > { %2951 = vmatpush3.msra.mxu1 %v2697_v50 }
 0x9be   : > { %2952 = vmatprep.subr.mxu1 %v3094_v9 }
 0x9bf   : > { %2953 = vmatpush3.msra.mxu1 %v2696_v51  ;;  %v2729_v51 = vld [vmem:[%s3662_s9 + $0x38] sm:$0xff] }
 0x9c0   : > { %2954 = vmatprep.subr.mxu1 %v3094_v9 }
 0x9c1   : > { %2955 = vmatpush3.msra.mxu1 %v2695_v52  ;;  %v2727_v52 = vld [vmem:[%s3662_s9 + $0x28] sm:$0xff] }
 0x9c2   : > { %2957 = vmatmul.mubr.msk.f32.vlgmr.msra.gmra.mxu1 %vm585_vm0, %v3457_v48  ;;  %2970 = vmatprep.subr.mxu1 %v3094_v9 }
 0x9c3   : > { %2972 = vmatprep.mubr.msk.f32.mxu1 %vm3095_vm1, %v3094_v9 }
 0xa7a   : > { %v1626_v54 = vpop.f32.mrf.mxu1  ;;  %v1792_v55 = vpop.f32.mrf.mxu0 }
 0xa7b   : > { %v1793_v56 = vadd.f32 %v2707_v53, %v1792_v55  ;;  %v1627_v62 = vadd.f32 %v2693_v60, %v1626_v54  ;;  %v2726_v53 = vld [vmem:[%s3662_s9 + $0x20] sm:$0xff] }
 0xa7c   : > { %v2947_v57 = vpop.f32.mrf.mxu1  ;;  %v2969_v58 = vpop.f32.mrf.mxu0  ;;  %v2725_v60 = vld [vmem:[%s3661_s8 + $0x1] ss:$0 sm:$0xff] }
 0xa7d   : > { %v1972_v59 = vmul.f32 %v3294_v41, %v1793_v56  ;;  %v1796_v2 = vmul.f32 %v3288_v33, %v1627_v62  ;;  %v1886_v3 = vmul.f32 %v3294_v41, %v1627_v62  ;;  %v1885_v4 = vmul.f32 %v3288_v33, %v1793_v56  ;;  %v2724_v58 = vld [vmem:[%s3660_s7 + $0x1] ss:$0 sm:$0xff] }
 0xa7f   : > { %2981 = vmatpush3.msra.mxu0 %v1972_v59 }
 0xa80   : > { %2990 = vmatprep.subr.mxu0 %v3094_v9 }
 0xa82   : > { %v1709_v63 = vpop.f32.mrf.mxu1 }
 0xa83   : > { %v1710_v0 = vadd.f32 %v2700_v61, %v1709_v63  ;;  %v2742_v63 = vld [vmem:[%s3664_s11 + $0x78] sm:$0xff] }
 0xa84   : > { %v2958_v1 = vpop.f32.mrf.mxu1 }
 0xa85   : > { %2971 = vmatpush3.xpose.msk.msra.mxu1 %vm585_vm0, %v1710_v0  ;;  %v2740_v1 = vld [vmem:[%s3664_s11 + $0x68] sm:$0xff] }
 0xa86   : > { %2975 = vmatprep.subr.mxu1 %v3094_v9 }
 0xa88   : > { %2973 = vmatmul.mubr.msk.f32.vlgmr.msra.gmra.mxu1 %vm585_vm0, %v1796_v2  ;;  %v2739_v2 = vld [vmem:[%s3664_s11 + $0x60] sm:$0xff] }
 0xa89   : > { %2976 = vmatpush3.xpose.msk.msra.mxu1 %vm585_vm0, %v1710_v0  ;;  %2977 = vmatprep.mubr.msk.f32.mxu1 %vm3095_vm1, %v3094_v9  ;;  %v2741_v0 = vld [vmem:[%s3664_s11 + $0x70] sm:$0xff] }
 0xa8a   : > { %2985 = vmatprep.subr.mxu1 %v3094_v9 }
 0xa8c   : > { %2978 = vmatmul.mubr.msk.f32.vlgmr.msra.gmra.mxu1 %vm585_vm0, %v1886_v3  ;;  %v2738_v3 = vld [vmem:[%s3664_s11 + $0x58] sm:$0xff] }
 0xa8d   : > { %2986 = vmatpush3.msra.mxu1 %v1885_v4  ;;  %2987 = vmatprep.mubr.msk.f32.mxu1 %vm3095_vm1, %v3094_v9  ;;  %v2737_v4 = vld [vmem:[%s3664_s11 + $0x50] sm:$0xff] }
 0xa8e   : > { %3001 = vmatprep.subr.mxu1 %v3094_v9 }
 0xb48   : > { %v1869_v5 = vpop.f32.mrf.mxu1 }
 0xb49   : > { %v1873_v6 = vmul.f32 0.25, %v1869_v5  ;;  %v2736_v5 = vld [vmem:[%s3664_s11 + $0x48] sm:$0xff] }
 0xb4a   : > { %v2974_v7 = vpop.f32.mrf.mxu1 }
 0xb4b   : > { %v1874_v8 = vsel %vm954_vm6, %v1873_v6, -inf  ;;  %v2731_v7 = vld [vmem:[%s3663_s10 + $0x1] ss:$0 sm:$0xff] }
 0xb4c   : > { %1875 = vmax.xlane.f32.xlu0 %v1874_v8  ;;  %v1956_v10 = vpop.f32.mrf.mxu1 }
 0xb4d   : > { %v1960_v41 = vmul.f32 0.25, %v1956_v10 }
 0xb4e   : > { %v2979_v11 = vpop.f32.mrf.mxu1 }
 0xb4f   : > { %v1961_v12 = vsel %vm954_vm6, %v1960_v41, -inf }
 0xb50   : > { %1962 = vmax.xlane.f32.xlu1 %v1961_v12 }
 0xbd5   : > { %v1876_v33 = vpop.xlane.xlu0 %1875 }
 0xbd6   : > { %v1877_v13 = vsub.f32 %v1873_v6, %v1876_v33  ;;  %v2735_v6 = vld [vmem:[%s3664_s11 + $0x40] sm:$0xff] }
 0xbd8   : > { %v1878_v14 = vmul.f32 1.442695, %v1877_v13 }
 0xbd9   : > { %v1963_v15 = vpop.xlane.xlu1 %1962 }
 0xbda   : > { %3070 = vpow2.f32 %v1878_v14  ;;  %v1964_v16 = vsub.f32 %v1960_v41, %v1963_v15 }
 0xbdc   : > { %v1965_v17 = vmul.f32 1.442695, %v1964_v16 }
 0xbde   : > { %3072 = vpow2.f32 %v1965_v17 }
 0xbe7   : > { %v3071_v18 = vpop.eup %3070 }
 0xbe8   : > { %v1880_v19 = vsel %vm954_vm6, %v3071_v18, 0.0 }
 0xbe9   : > { %1881 = vadd.xlane.f32.xlu0 %v1880_v19 }
 0xbeb   : > { %v3073_v20 = vpop.eup %3072 }
 0xbec   : > { %v1967_v21 = vsel %vm954_vm6, %v3073_v20, 0.0 }
 0xbed   : > { %1968 = vadd.xlane.f32.xlu1 %v1967_v21 }
 0xc72   : > { %v1882_v22 = vpop.xlane.xlu0 %1881 }
 0xc73   : > { %3074 = vrcp.f32 %v1882_v22 }
 0xc76   : > { %v1969_v23 = vpop.xlane.xlu1 %1968 }
 0xc77   : > { %3076 = vrcp.f32 %v1969_v23 }
 0xc80   : > { %v3075_v25 = vpop.eup %3074 }
 0xc81   : > { %v1884_v26 = vmul.f32 %v3075_v25, %v3071_v18 }
 0xc83   : > { %2988 = vmatmul.mubr.msk.f32.vlgmr.msra.gmra.mxu1 %vm954_vm6, %v1884_v26 }
 0xc84   : > { %v3077_v27 = vpop.eup %3076  ;;  %3009 = vmatprep.mubr.msk.f32.mxu1 %vm3095_vm1, %v3094_v9  ;;  %3002 = vmatpush3.msra.mxu1 %v2729_v51  ;;  %v2474_v51 = vld [vmem:[%s3668_s15 + $0x8] sm:$0xff] }
 0xc85   : > { %v1971_v28 = vmul.f32 %v3077_v27, %v3073_v20  ;;  %3003 = vmatprep.subr.mxu1 %v3094_v9 }
 0xc87   : > { %2983 = vmatmul.mubr.msk.f32.vlgmr.msra.gmra.mxu0 %vm954_vm6, %v1971_v28 }
 0xc88   : > { %2998 = vmatprep.mubr.msk.f32.mxu0 %vm3095_vm1, %v3094_v9  ;;  %2991 = vmatpush3.msra.mxu0 %v2718_v29 }
 0xc89   : > { %2992 = vmatprep.subr.mxu0 %v3094_v9 }
 0xc8a   : > { %2993 = vmatpush3.msra.mxu0 %v2717_v30 }
 0xc8b   : > { %2994 = vmatprep.subr.mxu0 %v3094_v9 }
 0xc8c   : > { %2995 = vmatpush3.msra.mxu0 %v2716_v31 }
 0xc8d   : > { %2996 = vmatprep.subr.mxu0 %v3094_v9 }
 0xc8e   : > { %2997 = vmatpush3.msra.mxu0 %v2715_v32 }
 0xc8f   : > { %3012 = vmatprep.subr.mxu0 %v3094_v9 }
 0xd43   : > { %v2115_v24 = vpop.f32.mrf.mxu1 }
 0xd45   : > { %v2989_v34 = vpop.f32.mrf.mxu1 }
 0xd47   : > { %v2042_v35 = vpop.f32.mrf.mxu0 }
 0xd48   : > { %v2116_v36 = vadd.f32 %v2115_v24, %v2042_v35 }
 0xd49   : > { %v2984_v37 = vpop.f32.mrf.mxu0 }
 0xd4a   : > { %2999 = vmatmul.mubr.msk.f32.vlgmr.msra.gmra.mxu0 %vm585_vm0, %v2116_v36  ;;  %v2744_v36 = vld [vmem:[%s3665_s12 + $0x1] ss:$0 sm:$0xff] }
 0xd4b   : > { %3028 = vmatprep.mubr.msk.f32.mxu0 %vm3095_vm1, %v3094_v9  ;;  %3013 = vmatpush3.msra.mxu0 %v2742_v63 }
 0xd4c   : > { %3014 = vmatprep.subr.mxu0 %v3094_v9 }
 0xd4d   : > { %3015 = vmatpush3.msra.mxu0 %v2741_v0 }
 0xd4e   : > { %3016 = vmatprep.subr.mxu0 %v3094_v9 }
 0xd4f   : > { %3017 = vmatpush3.msra.mxu0 %v2740_v1 }
 0xd50   : > { %3018 = vmatprep.subr.mxu0 %v3094_v9 }
 0xd51   : > { %3019 = vmatpush3.msra.mxu0 %v2739_v2 }
 0xd52   : > { %3020 = vmatprep.subr.mxu0 %v3094_v9 }
 0xd53   : > { %3021 = vmatpush3.msra.mxu0 %v2738_v3 }
 0xd54   : > { %3022 = vmatprep.subr.mxu0 %v3094_v9 }
 0xd55   : > { %3023 = vmatpush3.msra.mxu0 %v2737_v4 }
 0xd56   : > { %3024 = vmatprep.subr.mxu0 %v3094_v9 }
 0xd57   : > { %3025 = vmatpush3.msra.mxu0 %v2736_v5 }
 0xd58   : > { %3026 = vmatprep.subr.mxu0 %v3094_v9 }
 0xd59   : > { %3027 = vmatpush3.msra.mxu0 %v2735_v6 }
 0xe0a   : > { %v2201_v39 = vpop.f32.mrf.mxu0 }
 0xe0b   : > { %v2202_v40 = vadd.f32 %v2720_v38, %v2201_v39 }
 0xe0c   : > { %v3000_v42 = vpop.f32.mrf.mxu0 }
 0xe0d   : > { %v2205_v43 = vadd.f32 %v2202_v40, %v3457_v48  ;;  %v2728_v48 = vld [vmem:[%s3662_s9 + $0x30] sm:$0xff] }
 0xe0e   : > { %3004 = vmatpush3.msra.mxu1 %v2728_v48  ;;  %v2473_v48 = vld [vmem:[%s3668_s15] sm:$0xff] }
 0xe0f   : > { %v2210_v44 = vsel %vm585_vm0, %v2205_v43, 0.0  ;;  %3005 = vmatprep.subr.mxu1 %v3094_v9 }
 0xe10   : > { %2211 = vadd.xlane.f32.xlu0 %v2210_v44  ;;  %3006 = vmatpush3.msra.mxu1 %v2727_v52 }
 0xe11   : > { %3007 = vmatprep.subr.mxu1 %v3094_v9 }
 0xe12   : > { %3008 = vmatpush3.msra.mxu1 %v2726_v53 }
 0xe13   : > { %3031 = vmatprep.subr.mxu1 %v3094_v9 }
 0xe99   : > { %v2212_v45 = vpop.xlane.xlu0 %2211 }
 0xe9a   : > { %v2213_v46 = vmul.f32 0.03125, %v2212_v45 }
 0xe9c   : > { %v2214_v47 = vsub.f32 %v2205_v43, %v2213_v46 }
 0xe9e   : > { %v2215_v49 = vmul.f32 %v2214_v47, %v2214_v47 }
 0xea0   : > { %v2216_v50 = vsel %vm585_vm0, %v2215_v49, 0.0  ;;  %v2476_v49 = vld [vmem:[%s3668_s15 + $0x18] sm:$0xff] }
 0xea1   : > { %2217 = vadd.xlane.f32.xlu1 %v2216_v50  ;;  %v2475_v50 = vld [vmem:[%s3668_s15 + $0x10] sm:$0xff] }
 0xf2a   : > { %v2218_v54 = vpop.xlane.xlu1 %2217 }
 0xf2b   : > { %v2219_v55 = vmul.f32 0.03125, %v2218_v54 }
 0xf2d   : > { %v2220_v56 = vadd.f32 1e-12, %v2219_v55 }
 0xf2f   : > { %3078 = vrsqrt.f32 %v2220_v56  ;;  %v2748_v56 = vld [vmem:[%s3666_s13 + $0x1] ss:$0 sm:$0xff] }
 0xf3c   : > { %v3079_v57 = vpop.eup %3078 }
 0xf3d   : > { %v2222_v59 = vmul.f32 %v3079_v57, %v2214_v47 }
 0xf3f   : > { %v2229_v61 = vmul.f32 %v2724_v58, %v2222_v59  ;;  %v2749_v58 = vld [vmem:[%s3667_s14 + $0x1] ss:$0 sm:$0xff] }
 0xf41   : > { %v3569_v62 = vadd.f32 %v2725_v60, %v2229_v61  ;;  %v2750_v60 = vld [vmem:[%s3669_s16] ss:$0 sm:$0xff] }
 0xf43   : > { %3010 = vmatmul.mubr.msk.f32.vlgmr.msra.gmra.mxu1 %vm585_vm0, %v3569_v62 }
 0xf44   : > { %3039 = vmatprep.mubr.msk.f32.mxu1 %vm3095_vm1, %v3094_v9  ;;  %3032 = vmatpush3.msra.mxu1 %v2476_v49 }
 0xf45   : > { %3033 = vmatprep.subr.mxu1 %v3094_v9 }
 0xf46   : > { %3034 = vmatpush3.msra.mxu1 %v2475_v50 }
 0xf47   : > { %3035 = vmatprep.subr.mxu1 %v3094_v9 }
 0xf48   : > { %3036 = vmatpush3.msra.mxu1 %v2474_v51 }
 0xf49   : > { %3037 = vmatprep.subr.mxu1 %v3094_v9 }
 0xf4a   : > { %3038 = vmatpush3.msra.mxu1 %v2473_v48 }
0x1003   : > { %v2319_v8 = vpop.f32.mrf.mxu1 }
0x1004   : > { %v2320_v10 = vadd.f32 %v2731_v7, %v2319_v8 }
0x1005   : > { %v3011_v41 = vpop.f32.mrf.mxu1 }
0x1006   : > { %v2324_v11 = vmul.f32 0.70710677, %v2320_v10  ;;  %v2323_v24 = vmul.f32 0.5, %v2320_v10 }
0x1008   : > { %v2325_v12 = vand.u32 2147483647, %v2324_v11  ;;  %vm2345_vm9 = vcmp.lt.f32.partialorder %v2324_v11, 0.0 }
0x100a   : > { %v2326_v33 = vmul.f32 0.3275911, %v2325_v12  ;;  %v2339_v14 = vsub.f32 0.0, %v2325_v12 }
0x100c   : > { %v2327_v13 = vadd.f32 1.0, %v2326_v33  ;;  %v2340_v15 = vmul.f32 %v2339_v14, %v2325_v12 }
0x100e   : > { %3080 = vrcp.f32 %v2327_v13  ;;  %v2341_v18 = vmul.f32 1.442695, %v2340_v15 }
0x1010   : > { %3082 = vpow2.f32 %v2341_v18 }
0x101b   : > { %v3081_v16 = vpop.eup %3080 }
0x101c   : > { %v2330_v17 = vmul.f32 1.0614054, %v3081_v16 }
0x101d   : > { %v3083_v28 = vpop.eup %3082 }
0x101e   : > { %v2733_v19 = vadd.f32 -1.4531521, %v2330_v17 }
0x1020   : > { %v2332_v20 = vmul.f32 %v3081_v16, %v2733_v19 }
0x1022   : > { %v2333_v21 = vadd.f32 1.4214138, %v2332_v20 }
0x1024   : > { %v2334_v22 = vmul.f32 %v3081_v16, %v2333_v21 }
0x1026   : > { %v2734_v23 = vadd.f32 -0.28449672, %v2334_v22 }
0x1028   : > { %v2336_v25 = vmul.f32 %v3081_v16, %v2734_v23 }
0x102a   : > { %v2337_v26 = vadd.f32 0.2548296, %v2336_v25 }
0x102c   : > { %v2338_v27 = vmul.f32 %v3081_v16, %v2337_v26 }
0x102e   : > { %v2343_v29 = vmul.f32 %v3083_v28, %v2338_v27 }
0x1030   : > { %v2344_v30 = vsub.f32 1.0, %v2343_v29 }
0x1032   : > { %v2346_v31 = vsub.f32 0.0, %v2344_v30 }
0x1034   : > { %v2347_v32 = vsel %vm2345_vm9, %v2346_v31, %v2344_v30 }
0x1035   : > { %v2348_v34 = vadd.f32 1.0, %v2347_v32 }
0x1037   : > { %v2349_v35 = vmul.f32 %v2348_v34, %v2323_v24 }
0x1039   : > { %3029 = vmatmul.mubr.msk.f32.vlgmr.msra.gmra.mxu0 %vm1440_vm8, %v2349_v35 }
0x10f9   : > { %v2436_v37 = vpop.f32.mrf.mxu0 }
0x10fa   : > { %v2437_v38 = vadd.f32 %v2744_v36, %v2436_v37 }
0x10fb   : > { %v3030_v39 = vpop.f32.mrf.mxu0 }
0x10fc   : > { %v2440_v40 = vadd.f32 %v2437_v38, %v3569_v62 }
0x10fe   : > { %v2445_v42 = vsel %vm585_vm0, %v2440_v40, 0.0 }
0x10ff   : > { %2446 = vadd.xlane.f32.xlu0 %v2445_v42 }
0x1188   : > { %v2447_v43 = vpop.xlane.xlu0 %2446 }
0x1189   : > { %v2448_v44 = vmul.f32 0.03125, %v2447_v43 }
0x118b   : > { %v2449_v45 = vsub.f32 %v2440_v40, %v2448_v44 }
0x118d   : > { %v2450_v46 = vmul.f32 %v2449_v45, %v2449_v45 }
0x118f   : > { %v2451_v47 = vsel %vm585_vm0, %v2450_v46, 0.0 }
0x1190   : > { %2452 = vadd.xlane.f32.xlu1 %v2451_v47 }
0x1219   : > { %v2453_v52 = vpop.xlane.xlu1 %2452 }
0x121a   : > { %v2454_v53 = vmul.f32 0.03125, %v2453_v52 }
0x121c   : > { %v2455_v54 = vadd.f32 1e-12, %v2454_v53 }
0x121e   : > { %3084 = vrsqrt.f32 %v2455_v54 }
0x122b   : > { %v3085_v55 = vpop.eup %3084 }
0x122c   : > { %v2457_v57 = vmul.f32 %v3085_v55, %v2449_v45 }
0x122e   : > { %v2464_v59 = vmul.f32 %v2748_v56, %v2457_v57 }
0x1230   : > { %v2471_v9 = vadd.f32 %v2749_v58, %v2464_v59 }
0x1232   : > { %2472 = vst.msk [vmem:[%s577_s1] sm:$0xff] %vm585_vm0, %v2471_v9  ;;  %3040 = vmatmul.mubr.msk.f32.vlgmr.msra.gmra.mxu1 %vm585_vm0, %v2471_v9 }
0x12f2   : > { %v2553_v61 = vpop.f32.mrf.mxu1 }
0x12f3   : > { %v2554_v62 = vadd.f32 %v2750_v60, %v2553_v61 }
0x12f4   : > { %v3041_v63 = vpop.f32.mrf.mxu1 }
0x12f5   : > { %2557 = vst [vmem:[%s581_s23] sm:$0xff] %v2554_v62 }
0x12f6 PF: > { %s29_s27 = sadd.s32 1, %s3092_s27  }
0x12f7   : > { %p26_p4 = scmp.ge.s32.totalorder %s29_s27, 4  }
0x12f9   :  { %28 = sbr.rel (!%p26_p4) target bundleno = 4 (0x4), region = 150 }

</bundles_post_ra>
